<compile_context>
chip_gen: v7x
topology: tpu7x:2x2x1
jax: 0.10.0
libtpu: 0.0.40
codegen_flags: <defaults>
</compile_context>

<pallas_src>
import jax
import jax.numpy as jnp
from jax import lax
from jax.experimental import pallas as pl
from jax.experimental.pallas import tpu as pltpu

# ---- deterministic "parameters" of the MPM model (no learnable weights) ----
DIM = 3
GRID = 8                        # grid nodes per axis
NUM_NODES = GRID ** 3           # 512
DX = 1.0 / GRID
INV_DX = float(GRID)
DT = 1e-3
P_MASS = 1.0
P_VOL = (DX * 0.5) ** 3
GRAVITY = -9.8                  # applied on axis 2 (z)
BOUND = 2                       # wall thickness in grid cells
STRESS_COEF = -DT * P_VOL * 4.0 * INV_DX * INV_DX

LHS_ROWS = 16                   # 3 momentum + 9 affine (col-major) + 1 mass + 3 pad
TILE_N = 1024                   # particle chunk (multiple of 128)


def _axis_weights(pos_row, gcol):
    """Quadratic B-spline along one axis.

    pos_row: (1, P) particle coordinate scaled by INV_DX.
    gcol:    (8, 1) node coordinates 0..7.
    Returns (8, P); exact zero outside the 3-node support (distance >= 1.5)."""
    r = jnp.abs(pos_row - gcol)                  # (8, P)
    t = jnp.maximum(1.5 - r, 0.0)
    return jnp.where(r < 0.5, 0.75 - r * r, 0.5 * (t * t))


def _bspline_weights(xs, gcol):
    """Separable tensor-product weights: (3, P) scaled positions -> (512, P)."""
    p = xs.shape[1]
    wx = _axis_weights(xs[0:1, :], gcol)         # (8, P)
    wy = _axis_weights(xs[1:2, :], gcol)         # (8, P)
    wz = _axis_weights(xs[2:3, :], gcol)         # (8, P)
    wxy = (wx[:, None, :] * wy[None, :, :]).reshape(GRID * GRID, p)   # (64, P)
    return (wxy[:, None, :] * wz[None, :, :]).reshape(NUM_NODES, p)   # (512, P)


def mpm_extra_kernel(x_ref, lhs_ref, xe_ref, nrow_ref, out_ref, acc_ref):
    k = pl.program_id(0)

    @pl.when(k == 0)
    def _init():
        acc_ref[...] = jnp.zeros_like(acc_ref)

    gcol = lax.broadcasted_iota(jnp.int32, (GRID, 1), 0).astype(jnp.float32)

    # ---------------- P2G (main particles -> grid), one canonical matmul ----
    w = _bspline_weights(x_ref[...] * INV_DX, gcol)          # (512, TN)
    acc_ref[...] += lax.dot_general(
        w, lhs_ref[...], (((1,), (0,)), ((), ())),
        preferred_element_type=jnp.float32)                  # (512, 16)

    @pl.when(k == pl.num_programs(0) - 1)
    def _finalize():
        grid_t = acc_ref[...].T                              # (16, 512) tiny transpose
        nrow = nrow_ref[...]                                 # (3, 512) node ijk
        pos = nrow * DX                                      # (3, 512)

        # momentum = node-independent part + (scattered affine, col-major) @ x_node
        mv = (grid_t[0:3, :]
              + grid_t[3:6, :] * pos[0:1, :]
              + grid_t[6:9, :] * pos[1:2, :]
              + grid_t[9:12, :] * pos[2:3, :])               # (3, 512)
        m = grid_t[12:13, :]                                 # (1, 512)

        # ---------------- grid update ------------------------------------
        has_mass = m > 0.0
        inv_m = jnp.where(has_mass, 1.0 / jnp.where(has_mass, m, 1.0), 0.0)
        v_grid = mv * inv_m                                  # (3, 512)
        # gravity on axis 2 only where there is mass (no sublane concat)
        is_z = lax.broadcasted_iota(jnp.int32, (DIM, 1), 0) == (DIM - 1)
        v_grid = v_grid + jnp.where(jnp.logical_and(is_z, has_mass),
                                    DT * GRAVITY, 0.0)
        # wall boundary conditions: zero outward velocities near the walls
        low = jnp.logical_and(nrow < float(BOUND), v_grid < 0.0)
        high = jnp.logical_and(nrow > float(GRID - 1 - BOUND), v_grid > 0.0)
        v_grid = jnp.where(jnp.logical_or(low, high), 0.0, v_grid)

        # ---------------- G2P for the extra particles --------------------
        xe = xe_ref[...]                                     # (3, M)
        we = _bspline_weights(xe * INV_DX, gcol)             # (512, M)
        v_new = lax.dot_general(v_grid, we, (((1,), (0,)), ((), ())),
                                preferred_element_type=jnp.float32)  # (3, M)
        out_ref[...] = (xe + DT * v_new).astype(out_ref.dtype)
        # TODO(synk): forward_extra also advances v/C of the extra state and the
        # main state; the torch forward only returns x_extra, so only the
        # position update is materialized here.


def _round_up(n, m):
    return ((n + m - 1) // m) * m


@jax.jit
def mpm_extra_sim(x, v, C, F, stress, x_extra):
    """Pallas implementation of MPMExtraSim.forward -> x_extra (M, 3)."""
    del F  # returned x_extra does not depend on F (stress is already supplied)
    f32 = jnp.float32
    N = x.shape[0]
    M = x_extra.shape[0]

    x32, v32 = x.astype(f32), v.astype(f32)
    c32, s32 = C.astype(f32), stress.astype(f32)
    xe32 = x_extra.astype(f32)

    # ---- wrapper-side (particle-major, single XLA fusion) P2G LHS ----------
    affine = STRESS_COEF * s32 + P_MASS * c32                   # (N, 3, 3)
    q = P_MASS * v32 - jnp.einsum('pde,pe->pd', affine, x32)    # (N, 3)
    aff_cm = jnp.transpose(affine, (0, 2, 1)).reshape(N, DIM * DIM)  # col-major
    lhs = jnp.concatenate(
        [q, aff_cm,
         jnp.full((N, 1), P_MASS, f32),
         jnp.zeros((N, LHS_ROWS - 13), f32)], axis=1)           # (N, 16)

    # ---- particle/extra padding (zero LHS rows contribute nothing) ---------
    tn = min(TILE_N, _round_up(N, 128))
    npad = _round_up(N, tn)
    mpad = _round_up(M, 128)
    lhs = jnp.pad(lhs, ((0, npad - N), (0, 0)))
    x_cm = jnp.pad(x32.T, ((0, 0), (0, npad - N)), constant_values=0.5)
    xe_cm = jnp.pad(xe32.T, ((0, 0), (0, mpad - M)), constant_values=0.5)
    # TODO(synk): for very large M the (512, M) We tile should also be chunked.

    # static node ijk rows (node positions + boundary masks)
    idx = jnp.arange(NUM_NODES, dtype=jnp.int32)
    nrow = jnp.stack([idx // (GRID * GRID), (idx // GRID) % GRID, idx % GRID],
                     axis=0).astype(f32)                        # (3, 512)

    n_chunks = npad // tn

    cost = pl.CostEstimate(
        flops=2 * NUM_NODES * LHS_ROWS * npad + 2 * DIM * NUM_NODES * mpad
              + 16 * NUM_NODES * (npad + mpad),
        transcendentals=NUM_NODES,
        bytes_accessed=4 * ((DIM + LHS_ROWS) * npad + 2 * DIM * mpad
                            + DIM * NUM_NODES))

    out = pl.pallas_call(
        mpm_extra_kernel,
        out_shape=jax.ShapeDtypeStruct((DIM, mpad), f32),
        grid=(n_chunks,),
        in_specs=[
            pl.BlockSpec((DIM, tn), lambda k: (0, k)),          # x (3, Npad)
            pl.BlockSpec((tn, LHS_ROWS), lambda k: (k, 0)),     # lhs (Npad, 16)
            pl.BlockSpec((DIM, mpad), lambda k: (0, 0)),        # xe (3, Mpad)
            pl.BlockSpec((DIM, NUM_NODES), lambda k: (0, 0)),   # node ijk rows
        ],
        out_specs=pl.BlockSpec((DIM, mpad), lambda k: (0, 0)),
        scratch_shapes=[pltpu.VMEM((NUM_NODES, LHS_ROWS), f32)],
        compiler_params=pltpu.CompilerParams(
            dimension_semantics=("arbitrary",),
            vmem_limit_bytes=32 * 1024 * 1024),
        cost_estimate=cost,
    )(x_cm, lhs, xe_cm, nrow)                                   # (3, Mpad)

    # lane-dense kernel output; wrapper only slices + transposes
    return out[:, :M].T


if __name__ == "__main__":
    key = jax.random.PRNGKey(0)
    k1, k2, k3, k4, k5 = jax.random.split(key, 5)
    N, M = 128, 128
    # particles placed well inside [0,1]^3 so their 3x3x3 stencil fits the grid
    x = jax.random.uniform(k1, (N, DIM), jnp.float32, 0.35, 0.65)
    v = 0.1 * jax.random.normal(k2, (N, DIM), jnp.float32)
    C = 0.01 * jax.random.normal(k3, (N, DIM, DIM), jnp.float32)
    F = jnp.tile(jnp.eye(DIM, dtype=jnp.float32)[None], (N, 1, 1))
    stress = 0.1 * jax.random.normal(k4, (N, DIM, DIM), jnp.float32)
    x_extra = jax.random.uniform(k5, (M, DIM), jnp.float32, 0.35, 0.65)

    out = mpm_extra_sim(x, v, C, F, stress, x_extra)
    out = jax.block_until_ready(out)
    assert out.shape == (M, DIM)
    assert bool(jnp.all(jnp.isfinite(out)))
    print("KERNEL_OK")
</pallas_src>

<mosaic_0001>
module attributes {stable_mosaic.version = 11 : i64} {
  func.func @mpm_extra_kernel(%arg0: i32, %arg1: memref<3x128xf32, #tpu.memory_space<vmem>>, %arg2: memref<128x16xf32, #tpu.memory_space<vmem>>, %arg3: memref<3x128xf32, #tpu.memory_space<vmem>>, %arg4: memref<3x512xf32, #tpu.memory_space<vmem>>, %arg5: memref<3x128xf32, #tpu.memory_space<vmem>>, %arg6: memref<512x16xf32, #tpu.memory_space<vmem>>) attributes {dimension_semantics = [#tpu.dimension_semantics<arbitrary>], iteration_bounds = array<i64: 1>, scalar_prefetch = 0 : i64, scratch_operands = 1 : i64, tpu.core_type = #tpu.core_type<tc>, window_params = [{transform_indices = @transform_0, window_bounds = array<i64: 3, 128>}, {transform_indices = @transform_1, window_bounds = array<i64: 128, 16>}, {pipeline_mode = #tpu.pipeline_mode<synchronous>, transform_indices = @transform_2, window_bounds = array<i64: 3, 128>}, {pipeline_mode = #tpu.pipeline_mode<synchronous>, transform_indices = @transform_3, window_bounds = array<i64: 3, 512>}, {pipeline_mode = #tpu.pipeline_mode<synchronous>, transform_indices = @transform_4, window_bounds = array<i64: 3, 128>}]} {
    %c0_i32 = arith.constant 0 : i32
    %0 = arith.cmpi eq, %arg0, %c0_i32 : i32
    %1 = arith.extui %0 : i1 to i32
    %c0_i32_0 = arith.constant 0 : i32
    %2 = arith.cmpi ne, %1, %c0_i32_0 : i32
    scf.if %2 {
      %cst_26 = arith.constant 0.000000e+00 : f32
      %82 = vector.broadcast %cst_26 : f32 to vector<512x16xf32>
      %c0_27 = arith.constant 0 : index
      %c0_28 = arith.constant 0 : index
      %83 = vector.load %arg6[%c0_27, %c0_28] : memref<512x16xf32, #tpu.memory_space<vmem>>, vector<512x16xf32>
      tpu.vector_store %arg6[%c0_27, %c0_28], %82 {strides = array<i32>} : memref<512x16xf32, #tpu.memory_space<vmem>>, vector<512x16xf32>,
    } else {
    }
    %3 = tpu.iota {dimensions = array<i32: 0>} : vector<8x1xi32>
    %4 = arith.sitofp %3 : vector<8x1xi32> to vector<8x1xf32>
    %c0 = arith.constant 0 : index
    %c0_1 = arith.constant 0 : index
    %5 = vector.load %arg1[%c0, %c0_1] : memref<3x128xf32, #tpu.memory_space<vmem>>, vector<3x128xf32>
    %cst = arith.constant 8.000000e+00 : f32
    %6 = vector.broadcast %cst : f32 to vector<3x128xf32>
    %7 = arith.mulf %5, %6 : vector<3x128xf32>
    %8 = vector.extract_strided_slice %7 {offsets = [0, 0], sizes = [1, 128], strides = [1, 1]} : vector<3x128xf32> to vector<1x128xf32>
    %9 = vector.broadcast %8 : vector<1x128xf32> to vector<8x128xf32>
    %10 = vector.broadcast %4 : vector<8x1xf32> to vector<8x128xf32>
    %11 = arith.subf %9, %10 : vector<8x128xf32>
    %12 = math.absf %11 : vector<8x128xf32>
    %cst_2 = arith.constant 1.500000e+00 : f32
    %13 = vector.broadcast %cst_2 : f32 to vector<8x128xf32>
    %14 = arith.subf %13, %12 : vector<8x128xf32>
    %cst_3 = arith.constant 0.000000e+00 : f32
    %15 = vector.broadcast %cst_3 : f32 to vector<8x128xf32>
    %16 = arith.maximumf %14, %15 : vector<8x128xf32>
    %cst_4 = arith.constant 5.000000e-01 : f32
    %17 = vector.broadcast %cst_4 : f32 to vector<8x128xf32>
    %18 = arith.cmpf olt, %12, %17 : vector<8x128xf32>
    %19 = arith.mulf %12, %12 : vector<8x128xf32>
    %cst_5 = arith.constant 7.500000e-01 : f32
    %20 = vector.broadcast %cst_5 : f32 to vector<8x128xf32>
    %21 = arith.subf %20, %19 : vector<8x128xf32>
    %22 = arith.mulf %16, %16 : vector<8x128xf32>
    %cst_6 = arith.constant 5.000000e-01 : f32
    %23 = vector.broadcast %cst_6 : f32 to vector<8x128xf32>
    %24 = arith.mulf %23, %22 : vector<8x128xf32>
    %25 = arith.select %18, %21, %24 : vector<8x128xi1>, vector<8x128xf32>
    %26 = vector.extract_strided_slice %7 {offsets = [1, 0], sizes = [1, 128], strides = [1, 1]} : vector<3x128xf32> to vector<1x128xf32>
    %27 = vector.broadcast %26 : vector<1x128xf32> to vector<8x128xf32>
    %28 = vector.broadcast %4 : vector<8x1xf32> to vector<8x128xf32>
    %29 = arith.subf %27, %28 : vector<8x128xf32>
    %30 = math.absf %29 : vector<8x128xf32>
    %cst_7 = arith.constant 1.500000e+00 : f32
    %31 = vector.broadcast %cst_7 : f32 to vector<8x128xf32>
    %32 = arith.subf %31, %30 : vector<8x128xf32>
    %cst_8 = arith.constant 0.000000e+00 : f32
    %33 = vector.broadcast %cst_8 : f32 to vector<8x128xf32>
    %34 = arith.maximumf %32, %33 : vector<8x128xf32>
    %cst_9 = arith.constant 5.000000e-01 : f32
    %35 = vector.broadcast %cst_9 : f32 to vector<8x128xf32>
    %36 = arith.cmpf olt, %30, %35 : vector<8x128xf32>
    %37 = arith.mulf %30, %30 : vector<8x128xf32>
    %cst_10 = arith.constant 7.500000e-01 : f32
    %38 = vector.broadcast %cst_10 : f32 to vector<8x128xf32>
    %39 = arith.subf %38, %37 : vector<8x128xf32>
    %40 = arith.mulf %34, %34 : vector<8x128xf32>
    %cst_11 = arith.constant 5.000000e-01 : f32
    %41 = vector.broadcast %cst_11 : f32 to vector<8x128xf32>
    %42 = arith.mulf %41, %40 : vector<8x128xf32>
    %43 = arith.select %36, %39, %42 : vector<8x128xi1>, vector<8x128xf32>
    %44 = vector.extract_strided_slice %7 {offsets = [2, 0], sizes = [1, 128], strides = [1, 1]} : vector<3x128xf32> to vector<1x128xf32>
    %45 = vector.broadcast %44 : vector<1x128xf32> to vector<8x128xf32>
    %46 = vector.broadcast %4 : vector<8x1xf32> to vector<8x128xf32>
    %47 = arith.subf %45, %46 : vector<8x128xf32>
    %48 = math.absf %47 : vector<8x128xf32>
    %cst_12 = arith.constant 1.500000e+00 : f32
    %49 = vector.broadcast %cst_12 : f32 to vector<8x128xf32>
    %50 = arith.subf %49, %48 : vector<8x128xf32>
    %cst_13 = arith.constant 0.000000e+00 : f32
    %51 = vector.broadcast %cst_13 : f32 to vector<8x128xf32>
    %52 = arith.maximumf %50, %51 : vector<8x128xf32>
    %cst_14 = arith.constant 5.000000e-01 : f32
    %53 = vector.broadcast %cst_14 : f32 to vector<8x128xf32>
    %54 = arith.cmpf olt, %48, %53 : vector<8x128xf32>
    %55 = arith.mulf %48, %48 : vector<8x128xf32>
    %cst_15 = arith.constant 7.500000e-01 : f32
    %56 = vector.broadcast %cst_15 : f32 to vector<8x128xf32>
    %57 = arith.subf %56, %55 : vector<8x128xf32>
    %58 = arith.mulf %52, %52 : vector<8x128xf32>
    %cst_16 = arith.constant 5.000000e-01 : f32
    %59 = vector.broadcast %cst_16 : f32 to vector<8x128xf32>
    %60 = arith.mulf %59, %58 : vector<8x128xf32>
    %61 = arith.select %54, %57, %60 : vector<8x128xi1>, vector<8x128xf32>
    %62 = vector.shape_cast %25 : vector<8x128xf32> to vector<8x1x128xf32>
    %63 = vector.shape_cast %43 : vector<8x128xf32> to vector<1x8x128xf32>
    %64 = vector.broadcast %62 : vector<8x1x128xf32> to vector<8x8x128xf32>
    %65 = vector.broadcast %63 : vector<1x8x128xf32> to vector<8x8x128xf32>
    %66 = arith.mulf %64, %65 : vector<8x8x128xf32>
    %67 = vector.shape_cast %66 : vector<8x8x128xf32> to vector<64x128xf32>
    %68 = vector.shape_cast %67 : vector<64x128xf32> to vector<64x1x128xf32>
    %69 = vector.shape_cast %61 : vector<8x128xf32> to vector<1x8x128xf32>
    %70 = vector.broadcast %68 : vector<64x1x128xf32> to vector<64x8x128xf32>
    %71 = vector.broadcast %69 : vector<1x8x128xf32> to vector<64x8x128xf32>
    %72 = arith.mulf %70, %71 : vector<64x8x128xf32>
    %73 = vector.shape_cast %72 : vector<64x8x128xf32> to vector<512x128xf32>
    %c0_17 = arith.constant 0 : index
    %c0_18 = arith.constant 0 : index
    %74 = vector.load %arg6[%c0_17, %c0_18] : memref<512x16xf32, #tpu.memory_space<vmem>>, vector<512x16xf32>
    %c0_19 = arith.constant 0 : index
    %c0_20 = arith.constant 0 : index
    %75 = vector.load %arg2[%c0_19, %c0_20] : memref<128x16xf32, #tpu.memory_space<vmem>>, vector<128x16xf32>
    %cst_21 = arith.constant dense<0.000000e+00> : vector<512x16xf32>
    %76 = tpu.matmul %73, %75, %cst_21 {dimension_numbers = #tpu.dot_dimension_numbers<[1], [0], [0], [1], [0, 0, 1, 1], [], []>} : vector<512x128xf32>, vector<128x16xf32>, vector<512x16xf32> -> vector<512x16xf32>
    %77 = arith.addf %74, %76 : vector<512x16xf32>
    %c0_22 = arith.constant 0 : index
    %c0_23 = arith.constant 0 : index
    %78 = vector.load %arg6[%c0_22, %c0_23] : memref<512x16xf32, #tpu.memory_space<vmem>>, vector<512x16xf32>
    tpu.vector_store %arg6[%c0_22, %c0_23], %77 {strides = array<i32>} : memref<512x16xf32, #tpu.memory_space<vmem>>, vector<512x16xf32>,
    %c0_i32_24 = arith.constant 0 : i32
    %79 = arith.cmpi eq, %arg0, %c0_i32_24 : i32
    %80 = arith.extui %79 : i1 to i32
    %c0_i32_25 = arith.constant 0 : i32
    %81 = arith.cmpi ne, %80, %c0_i32_25 : i32
    scf.if %81 {
      %c0_26 = arith.constant 0 : index
      %c0_27 = arith.constant 0 : index
      %82 = vector.load %arg6[%c0_26, %c0_27] : memref<512x16xf32, #tpu.memory_space<vmem>>, vector<512x16xf32>
      %83 = tpu.transpose %82, [1, 0] : vector<512x16xf32> -> vector<16x512xf32>
      %c0_28 = arith.constant 0 : index
      %c0_29 = arith.constant 0 : index
      %84 = vector.load %arg4[%c0_28, %c0_29] : memref<3x512xf32, #tpu.memory_space<vmem>>, vector<3x512xf32>
      %cst_30 = arith.constant 1.250000e-01 : f32
      %85 = vector.broadcast %cst_30 : f32 to vector<3x512xf32>
      %86 = arith.mulf %84, %85 : vector<3x512xf32>
      %87 = vector.extract_strided_slice %83 {offsets = [0, 0], sizes = [3, 512], strides = [1, 1]} : vector<16x512xf32> to vector<3x512xf32>
      %88 = vector.extract_strided_slice %83 {offsets = [3, 0], sizes = [3, 512], strides = [1, 1]} : vector<16x512xf32> to vector<3x512xf32>
      %89 = vector.extract_strided_slice %86 {offsets = [0, 0], sizes = [1, 512], strides = [1, 1]} : vector<3x512xf32> to vector<1x512xf32>
      %90 = vector.broadcast %89 : vector<1x512xf32> to vector<3x512xf32>
      %91 = arith.mulf %88, %90 : vector<3x512xf32>
      %92 = arith.addf %87, %91 : vector<3x512xf32>
      %93 = vector.extract_strided_slice %83 {offsets = [6, 0], sizes = [3, 512], strides = [1, 1]} : vector<16x512xf32> to vector<3x512xf32>
      %94 = vector.extract_strided_slice %86 {offsets = [1, 0], sizes = [1, 512], strides = [1, 1]} : vector<3x512xf32> to vector<1x512xf32>
      %95 = vector.broadcast %94 : vector<1x512xf32> to vector<3x512xf32>
      %96 = arith.mulf %93, %95 : vector<3x512xf32>
      %97 = arith.addf %92, %96 : vector<3x512xf32>
      %98 = vector.extract_strided_slice %83 {offsets = [9, 0], sizes = [3, 512], strides = [1, 1]} : vector<16x512xf32> to vector<3x512xf32>
      %99 = vector.extract_strided_slice %86 {offsets = [2, 0], sizes = [1, 512], strides = [1, 1]} : vector<3x512xf32> to vector<1x512xf32>
      %100 = vector.broadcast %99 : vector<1x512xf32> to vector<3x512xf32>
      %101 = arith.mulf %98, %100 : vector<3x512xf32>
      %102 = arith.addf %97, %101 : vector<3x512xf32>
      %103 = vector.extract_strided_slice %83 {offsets = [12, 0], sizes = [1, 512], strides = [1, 1]} : vector<16x512xf32> to vector<1x512xf32>
      %cst_31 = arith.constant 0.000000e+00 : f32
      %104 = vector.broadcast %cst_31 : f32 to vector<1x512xf32>
      %105 = arith.cmpf ogt, %103, %104 : vector<1x512xf32>
      %cst_32 = arith.constant 1.000000e+00 : f32
      %106 = vector.broadcast %cst_32 : f32 to vector<1x512xf32>
      %107 = arith.select %105, %103, %106 : vector<1x512xi1>, vector<1x512xf32>
      %cst_33 = arith.constant 1.000000e+00 : f32
      %108 = vector.broadcast %cst_33 : f32 to vector<1x512xf32>
      %109 = arith.divf %108, %107 : vector<1x512xf32>
      %cst_34 = arith.constant 0.000000e+00 : f32
      %110 = vector.broadcast %cst_34 : f32 to vector<1x512xf32>
      %111 = arith.select %105, %109, %110 : vector<1x512xi1>, vector<1x512xf32>
      %112 = vector.broadcast %111 : vector<1x512xf32> to vector<3x512xf32>
      %113 = arith.mulf %102, %112 : vector<3x512xf32>
      %114 = tpu.iota {dimensions = array<i32: 0>} : vector<3x1xi32>
      %c2_i32 = arith.constant 2 : i32
      %115 = vector.broadcast %c2_i32 : i32 to vector<3x1xi32>
      %116 = arith.cmpi eq, %114, %115 : vector<3x1xi32>
      %117 = vector.broadcast %116 : vector<3x1xi1> to vector<3x512xi1>
      %118 = vector.broadcast %105 : vector<1x512xi1> to vector<3x512xi1>
      %119 = arith.andi %117, %118 : vector<3x512xi1>
      %cst_35 = arith.constant -9.800000e-03 : f32
      %cst_36 = arith.constant 0.000000e+00 : f32
      %120 = vector.broadcast %cst_35 : f32 to vector<3x512xf32>
      %121 = vector.broadcast %cst_36 : f32 to vector<3x512xf32>
      %122 = arith.select %119, %120, %121 : vector<3x512xi1>, vector<3x512xf32>
      %123 = arith.addf %113, %122 : vector<3x512xf32>
      %cst_37 = arith.constant 2.000000e+00 : f32
      %124 = vector.broadcast %cst_37 : f32 to vector<3x512xf32>
      %125 = arith.cmpf olt, %84, %124 : vector<3x512xf32>
      %cst_38 = arith.constant 0.000000e+00 : f32
      %126 = vector.broadcast %cst_38 : f32 to vector<3x512xf32>
      %127 = arith.cmpf olt, %123, %126 : vector<3x512xf32>
      %128 = arith.andi %125, %127 : vector<3x512xi1>
      %cst_39 = arith.constant 5.000000e+00 : f32
      %129 = vector.broadcast %cst_39 : f32 to vector<3x512xf32>
      %130 = arith.cmpf ogt, %84, %129 : vector<3x512xf32>
      %cst_40 = arith.constant 0.000000e+00 : f32
      %131 = vector.broadcast %cst_40 : f32 to vector<3x512xf32>
      %132 = arith.cmpf ogt, %123, %131 : vector<3x512xf32>
      %133 = arith.andi %130, %132 : vector<3x512xi1>
      %134 = arith.ori %128, %133 : vector<3x512xi1>
      %cst_41 = arith.constant 0.000000e+00 : f32
      %135 = vector.broadcast %cst_41 : f32 to vector<3x512xf32>
      %136 = arith.select %134, %135, %123 : vector<3x512xi1>, vector<3x512xf32>
      %c0_42 = arith.constant 0 : index
      %c0_43 = arith.constant 0 : index
      %137 = vector.load %arg3[%c0_42, %c0_43] : memref<3x128xf32, #tpu.memory_space<vmem>>, vector<3x128xf32>
      %cst_44 = arith.constant 8.000000e+00 : f32
      %138 = vector.broadcast %cst_44 : f32 to vector<3x128xf32>
      %139 = arith.mulf %137, %138 : vector<3x128xf32>
      %140 = vector.extract_strided_slice %139 {offsets = [0, 0], sizes = [1, 128], strides = [1, 1]} : vector<3x128xf32> to vector<1x128xf32>
      %141 = vector.broadcast %140 : vector<1x128xf32> to vector<8x128xf32>
      %142 = vector.broadcast %4 : vector<8x1xf32> to vector<8x128xf32>
      %143 = arith.subf %141, %142 : vector<8x128xf32>
      %144 = math.absf %143 : vector<8x128xf32>
      %cst_45 = arith.constant 1.500000e+00 : f32
      %145 = vector.broadcast %cst_45 : f32 to vector<8x128xf32>
      %146 = arith.subf %145, %144 : vector<8x128xf32>
      %cst_46 = arith.constant 0.000000e+00 : f32
      %147 = vector.broadcast %cst_46 : f32 to vector<8x128xf32>
      %148 = arith.maximumf %146, %147 : vector<8x128xf32>
      %cst_47 = arith.constant 5.000000e-01 : f32
      %149 = vector.broadcast %cst_47 : f32 to vector<8x128xf32>
      %150 = arith.cmpf olt, %144, %149 : vector<8x128xf32>
      %151 = arith.mulf %144, %144 : vector<8x128xf32>
      %cst_48 = arith.constant 7.500000e-01 : f32
      %152 = vector.broadcast %cst_48 : f32 to vector<8x128xf32>
      %153 = arith.subf %152, %151 : vector<8x128xf32>
      %154 = arith.mulf %148, %148 : vector<8x128xf32>
      %cst_49 = arith.constant 5.000000e-01 : f32
      %155 = vector.broadcast %cst_49 : f32 to vector<8x128xf32>
      %156 = arith.mulf %155, %154 : vector<8x128xf32>
      %157 = arith.select %150, %153, %156 : vector<8x128xi1>, vector<8x128xf32>
      %158 = vector.extract_strided_slice %139 {offsets = [1, 0], sizes = [1, 128], strides = [1, 1]} : vector<3x128xf32> to vector<1x128xf32>
      %159 = vector.broadcast %158 : vector<1x128xf32> to vector<8x128xf32>
      %160 = vector.broadcast %4 : vector<8x1xf32> to vector<8x128xf32>
      %161 = arith.subf %159, %160 : vector<8x128xf32>
      %162 = math.absf %161 : vector<8x128xf32>
      %cst_50 = arith.constant 1.500000e+00 : f32
      %163 = vector.broadcast %cst_50 : f32 to vector<8x128xf32>
      %164 = arith.subf %163, %162 : vector<8x128xf32>
      %cst_51 = arith.constant 0.000000e+00 : f32
      %165 = vector.broadcast %cst_51 : f32 to vector<8x128xf32>
      %166 = arith.maximumf %164, %165 : vector<8x128xf32>
      %cst_52 = arith.constant 5.000000e-01 : f32
      %167 = vector.broadcast %cst_52 : f32 to vector<8x128xf32>
      %168 = arith.cmpf olt, %162, %167 : vector<8x128xf32>
      %169 = arith.mulf %162, %162 : vector<8x128xf32>
      %cst_53 = arith.constant 7.500000e-01 : f32
      %170 = vector.broadcast %cst_53 : f32 to vector<8x128xf32>
      %171 = arith.subf %170, %169 : vector<8x128xf32>
      %172 = arith.mulf %166, %166 : vector<8x128xf32>
      %cst_54 = arith.constant 5.000000e-01 : f32
      %173 = vector.broadcast %cst_54 : f32 to vector<8x128xf32>
      %174 = arith.mulf %173, %172 : vector<8x128xf32>
      %175 = arith.select %168, %171, %174 : vector<8x128xi1>, vector<8x128xf32>
      %176 = vector.extract_strided_slice %139 {offsets = [2, 0], sizes = [1, 128], strides = [1, 1]} : vector<3x128xf32> to vector<1x128xf32>
      %177 = vector.broadcast %176 : vector<1x128xf32> to vector<8x128xf32>
      %178 = vector.broadcast %4 : vector<8x1xf32> to vector<8x128xf32>
      %179 = arith.subf %177, %178 : vector<8x128xf32>
      %180 = math.absf %179 : vector<8x128xf32>
      %cst_55 = arith.constant 1.500000e+00 : f32
      %181 = vector.broadcast %cst_55 : f32 to vector<8x128xf32>
      %182 = arith.subf %181, %180 : vector<8x128xf32>
      %cst_56 = arith.constant 0.000000e+00 : f32
      %183 = vector.broadcast %cst_56 : f32 to vector<8x128xf32>
      %184 = arith.maximumf %182, %183 : vector<8x128xf32>
      %cst_57 = arith.constant 5.000000e-01 : f32
      %185 = vector.broadcast %cst_57 : f32 to vector<8x128xf32>
      %186 = arith.cmpf olt, %180, %185 : vector<8x128xf32>
      %187 = arith.mulf %180, %180 : vector<8x128xf32>
      %cst_58 = arith.constant 7.500000e-01 : f32
      %188 = vector.broadcast %cst_58 : f32 to vector<8x128xf32>
      %189 = arith.subf %188, %187 : vector<8x128xf32>
      %190 = arith.mulf %184, %184 : vector<8x128xf32>
      %cst_59 = arith.constant 5.000000e-01 : f32
      %191 = vector.broadcast %cst_59 : f32 to vector<8x128xf32>
      %192 = arith.mulf %191, %190 : vector<8x128xf32>
      %193 = arith.select %186, %189, %192 : vector<8x128xi1>, vector<8x128xf32>
      %194 = vector.shape_cast %157 : vector<8x128xf32> to vector<8x1x128xf32>
      %195 = vector.shape_cast %175 : vector<8x128xf32> to vector<1x8x128xf32>
      %196 = vector.broadcast %194 : vector<8x1x128xf32> to vector<8x8x128xf32>
      %197 = vector.broadcast %195 : vector<1x8x128xf32> to vector<8x8x128xf32>
      %198 = arith.mulf %196, %197 : vector<8x8x128xf32>
      %199 = vector.shape_cast %198 : vector<8x8x128xf32> to vector<64x128xf32>
      %200 = vector.shape_cast %199 : vector<64x128xf32> to vector<64x1x128xf32>
      %201 = vector.shape_cast %193 : vector<8x128xf32> to vector<1x8x128xf32>
      %202 = vector.broadcast %200 : vector<64x1x128xf32> to vector<64x8x128xf32>
      %203 = vector.broadcast %201 : vector<1x8x128xf32> to vector<64x8x128xf32>
      %204 = arith.mulf %202, %203 : vector<64x8x128xf32>
      %205 = vector.shape_cast %204 : vector<64x8x128xf32> to vector<512x128xf32>
      %cst_60 = arith.constant dense<0.000000e+00> : vector<3x128xf32>
      %206 = tpu.matmul %136, %205, %cst_60 {dimension_numbers = #tpu.dot_dimension_numbers<[1], [0], [0], [1], [0, 0, 1, 1], [], []>} : vector<3x512xf32>, vector<512x128xf32>, vector<3x128xf32> -> vector<3x128xf32>
      %cst_61 = arith.constant 1.000000e-03 : f32
      %207 = vector.broadcast %cst_61 : f32 to vector<3x128xf32>
      %208 = arith.mulf %207, %206 : vector<3x128xf32>
      %209 = arith.addf %137, %208 : vector<3x128xf32>
      %c0_62 = arith.constant 0 : index
      %c0_63 = arith.constant 0 : index
      %210 = vector.load %arg5[%c0_62, %c0_63] : memref<3x128xf32, #tpu.memory_space<vmem>>, vector<3x128xf32>
      tpu.vector_store %arg5[%c0_62, %c0_63], %209 {strides = array<i32>} : memref<3x128xf32, #tpu.memory_space<vmem>>, vector<3x128xf32>,
    } else {
    }
    return
  }
  func.func @transform_0(%arg0: i32) -> (i32, i32) {
    %c0_i32 = arith.constant 0 : i32
    %c0_i32_0 = arith.constant 0 : i32
    return %c0_i32, %arg0 : i32, i32
  }
  func.func @transform_1(%arg0: i32) -> (i32, i32) {
    %c0_i32 = arith.constant 0 : i32
    %c0_i32_0 = arith.constant 0 : i32
    return %arg0, %c0_i32 : i32, i32
  }
  func.func @transform_2(%arg0: i32) -> (i32, i32) {
    %c0_i32 = arith.constant 0 : i32
    %c0_i32_0 = arith.constant 0 : i32
    %c0_i32_1 = arith.constant 0 : i32
    return %c0_i32, %c0_i32_0 : i32, i32
  }
  func.func @transform_3(%arg0: i32) -> (i32, i32) {
    %c0_i32 = arith.constant 0 : i32
    %c0_i32_0 = arith.constant 0 : i32
    %c0_i32_1 = arith.constant 0 : i32
    return %c0_i32, %c0_i32_0 : i32, i32
  }
  func.func @transform_4(%arg0: i32) -> (i32, i32) {
    %c0_i32 = arith.constant 0 : i32
    %c0_i32_0 = arith.constant 0 : i32
    %c0_i32_1 = arith.constant 0 : i32
    return %c0_i32, %c0_i32_0 : i32, i32
  }
}

</mosaic_0001>

<bundles_post_ra>
// kernel: sub.5
= control target key start
LH: loop header
LB: loop body
LE: loop exit
PB: predicated region body
PF: predicated region fallthrough
CT: control target
= control target key end

     0   :  { %s34_s0 = inlined_call_operand.vmem [shape: f32[128,3], index: 0, kind: input, shape index: {}]   ;;  %s35_s1 = inlined_call_operand.vmem [shape: f32[128,3], index: 1, kind: input, shape index: {}]   ;;  %s36_s2 = inlined_call_operand.vmem [shape: f32[128,3], index: 2, kind: output, shape index: {}]  }
   0x1   :  { %v3_v0 = vld [vmem:[%s34_s0] sm:$0x7] }
   0x2   :  { %v4_v1 = vld [vmem:[%s35_s1] sm:$0x7] }
   0x3   :  { %v7_v2 = vsub.f32 %v3_v0, %v4_v1 }
   0x5   :  { %9 = vst [vmem:[%s36_s2] sm:$0xf] %v7_v2 }

// kernel: mpm_extra_sim.1
= control target key start
LH: loop header
LB: loop body
LE: loop exit
PB: predicated region body
PF: predicated region fallthrough
CT: control target
= control target key end

     0   :  { %v87_v3 = vlaneseq  ;;  %vm22_vm0 = vcmask 130048   ;;  %v3639_v10 = vmov 0.0   ;;  %s4702_s0 = inlined_call_operand.vmem [shape: f32[3,128], index: 0, kind: input, shape index: {}]   ;;  %s4703_s1 = inlined_call_operand.vmem [shape: f32[128,16], index: 1, kind: input, shape index: {}]   ;;  %s4704_s2 = inlined_call_operand.vmem [shape: f32[3,128], index: 2, kind: input, shape index: {}]   ;;  %s4705_s3 = inlined_call_operand.vmem [shape: f32[3,512], index: 3, kind: input, shape index: {}]   ;;  %s4706_s4 = inlined_call_operand.hbm [shape: f32[3,128], index: 4, kind: output, shape index: {}]  }
   0x1   :  { %v1080_v0 = vld [vmem:[%s4703_s1] sm:$0xff]  ;;  %v1081_v1 = vld [vmem:[%s4703_s1 + $0x8] sm:$0xff]  ;;  %v1082_v2 = vld [vmem:[%s4703_s1 + $0x10] sm:$0xff]  ;;  %24 = vst.msk [vmem:[#allocation2 + $0x8] sm:$0xff] %vm22_vm0, %v3639_v10 }
   0x2   :  { %v3677_v4 = vpack.c.bf16 %v1081_v1, %v1080_v0  ;;  %v1083_v5 = vld [vmem:[%s4703_s1 + $0x18] sm:$0xff]  ;;  %v3687_v7 = vld [vmem:[%s4703_s1 + $0x20] sm:$0xff]  ;;  %v3692_v8 = vld [vmem:[%s4703_s1 + $0x28] sm:$0xff]  ;;  %v3694_v9 = vshrl.u32 %v87_v3, 7  ;;  %23 = vst.msk [vmem:[#allocation2] sm:$0xff] %vm22_vm0, %v3639_v10 }
   0x3   :  { %v3682_v6 = vpack.c.bf16 %v1083_v5, %v1082_v2  ;;  %25 = vst.msk [vmem:[#allocation2 + $0x10] sm:$0xff] %vm22_vm0, %v3639_v10  ;;  %26 = vst.msk [vmem:[#allocation2 + $0x18] sm:$0xff] %vm22_vm0, %v3639_v10  ;;  %v3498_v12 = vpack.c.bf16 %v3692_v8, %v3687_v7  ;;  %v90_v13 = vld [vmem:[%s4702_s0] sm:$0x7]  ;;  %v1086_v16 = vld [vmem:[%s4703_s1 + $0x30] sm:$0xff] }
   0x4   :  { %27 = vst.msk [vmem:[#allocation2 + $0x20] sm:$0xff] %vm22_vm0, %v3639_v10  ;;  %28 = vst.msk [vmem:[#allocation2 + $0x28] sm:$0xff] %vm22_vm0, %v3639_v10  ;;  %3491 = vmatprep.subr.bf16.mxu0 %v3677_v4  ;;  %3586 = vmatprep.subr.bf16.mxu1 %v3677_v4  ;;  %v3828_v11 = vsub.s32 0, %v3694_v9  ;;  %v3838_v14 = vsub.s32 1, %v3694_v9  ;;  %v3841_v15 = vsub.s32 2, %v3694_v9  ;;  %v1087_v17 = vld [vmem:[%s4703_s1 + $0x38] sm:$0xff]  ;;  %v3851_v18 = vcvt.s32.f32 %v3694_v9 }
   0x5   :  { %29 = vst.msk [vmem:[#allocation2 + $0x30] sm:$0xff] %vm22_vm0, %v3639_v10  ;;  %30 = vst.msk [vmem:[#allocation2 + $0x38] sm:$0xff] %vm22_vm0, %v3639_v10  ;;  %3493 = vmatpush3.bf16.msra.mxu0 %v3677_v4  ;;  %3594 = vmatpush3.bf16.msra.mxu1 %v3677_v4  ;;  %v91_v19 = vmul.f32 8.0, %v90_v13 }
   0x6   :  { %31 = vst.msk [vmem:[#allocation2 + $0x40] sm:$0xff] %vm22_vm0, %v3639_v10  ;;  %32 = vst.msk [vmem:[#allocation2 + $0x48] sm:$0xff] %vm22_vm0, %v3639_v10  ;;  %3495 = vmatprep.subr.bf16.mxu0 %v3682_v6  ;;  %3587 = vmatprep.subr.bf16.mxu1 %v3682_v6 }
   0x7   :  { %33 = vst.msk [vmem:[#allocation2 + $0x50] sm:$0xff] %vm22_vm0, %v3639_v10  ;;  %34 = vst.msk [vmem:[#allocation2 + $0x58] sm:$0xff] %vm22_vm0, %v3639_v10 }
   0x8   :  { %35 = vst.msk [vmem:[#allocation2 + $0x60] sm:$0xff] %vm22_vm0, %v3639_v10  ;;  %36 = vst.msk [vmem:[#allocation2 + $0x68] sm:$0xff] %vm22_vm0, %v3639_v10 }
   0x9   :  { %37 = vst.msk [vmem:[#allocation2 + $0x70] sm:$0xff] %vm22_vm0, %v3639_v10  ;;  %38 = vst.msk [vmem:[#allocation2 + $0x78] sm:$0xff] %vm22_vm0, %v3639_v10 }
   0xa   :  { %39 = vst.msk [vmem:[#allocation2 + $0x80] sm:$0xff] %vm22_vm0, %v3639_v10  ;;  %40 = vst.msk [vmem:[#allocation2 + $0x88] sm:$0xff] %vm22_vm0, %v3639_v10 }
   0xb   :  { %41 = vst.msk [vmem:[#allocation2 + $0x90] sm:$0xff] %vm22_vm0, %v3639_v10  ;;  %42 = vst.msk [vmem:[#allocation2 + $0x98] sm:$0xff] %vm22_vm0, %v3639_v10 }
   0xc   :  { %43 = vst.msk [vmem:[#allocation2 + $0xa0] sm:$0xff] %vm22_vm0, %v3639_v10  ;;  %44 = vst.msk [vmem:[#allocation2 + $0xa8] sm:$0xff] %vm22_vm0, %v3639_v10 }
   0xd   :  { %45 = vst.msk [vmem:[#allocation2 + $0xb0] sm:$0xff] %vm22_vm0, %v3639_v10  ;;  %46 = vst.msk [vmem:[#allocation2 + $0xb8] sm:$0xff] %vm22_vm0, %v3639_v10 }
   0xe   :  { %47 = vst.msk [vmem:[#allocation2 + $0xc0] sm:$0xff] %vm22_vm0, %v3639_v10  ;;  %48 = vst.msk [vmem:[#allocation2 + $0xc8] sm:$0xff] %vm22_vm0, %v3639_v10 }
   0xf   :  { %49 = vst.msk [vmem:[#allocation2 + $0xd0] sm:$0xff] %vm22_vm0, %v3639_v10  ;;  %50 = vst.msk [vmem:[#allocation2 + $0xd8] sm:$0xff] %vm22_vm0, %v3639_v10 }
  0x10   :  { %51 = vst.msk [vmem:[#allocation2 + $0xe0] sm:$0xff] %vm22_vm0, %v3639_v10  ;;  %52 = vst.msk [vmem:[#allocation2 + $0xe8] sm:$0xff] %vm22_vm0, %v3639_v10 }
  0x11   :  { %53 = vst.msk [vmem:[#allocation2 + $0xf0] sm:$0xff] %vm22_vm0, %v3639_v10  ;;  %54 = vst.msk [vmem:[#allocation2 + $0xf8] sm:$0xff] %vm22_vm0, %v3639_v10 }
  0x12   :  { %55 = vst.msk [vmem:[#allocation2 + $0x100] sm:$0xff] %vm22_vm0, %v3639_v10  ;;  %56 = vst.msk [vmem:[#allocation2 + $0x108] sm:$0xff] %vm22_vm0, %v3639_v10 }
  0x13   :  { %57 = vst.msk [vmem:[#allocation2 + $0x110] sm:$0xff] %vm22_vm0, %v3639_v10  ;;  %58 = vst.msk [vmem:[#allocation2 + $0x118] sm:$0xff] %vm22_vm0, %v3639_v10 }
  0x14   :  { %59 = vst.msk [vmem:[#allocation2 + $0x120] sm:$0xff] %vm22_vm0, %v3639_v10  ;;  %60 = vst.msk [vmem:[#allocation2 + $0x128] sm:$0xff] %vm22_vm0, %v3639_v10 }
  0x15   :  { %61 = vst.msk [vmem:[#allocation2 + $0x130] sm:$0xff] %vm22_vm0, %v3639_v10  ;;  %62 = vst.msk [vmem:[#allocation2 + $0x138] sm:$0xff] %vm22_vm0, %v3639_v10 }
  0x16   :  { %63 = vst.msk [vmem:[#allocation2 + $0x140] sm:$0xff] %vm22_vm0, %v3639_v10  ;;  %64 = vst.msk [vmem:[#allocation2 + $0x148] sm:$0xff] %vm22_vm0, %v3639_v10 }
  0x17   :  { %65 = vst.msk [vmem:[#allocation2 + $0x150] sm:$0xff] %vm22_vm0, %v3639_v10  ;;  %66 = vst.msk [vmem:[#allocation2 + $0x158] sm:$0xff] %vm22_vm0, %v3639_v10 }
  0x18   :  { %67 = vst.msk [vmem:[#allocation2 + $0x160] sm:$0xff] %vm22_vm0, %v3639_v10  ;;  %68 = vst.msk [vmem:[#allocation2 + $0x168] sm:$0xff] %vm22_vm0, %v3639_v10 }
  0x19   :  { %69 = vst.msk [vmem:[#allocation2 + $0x170] sm:$0xff] %vm22_vm0, %v3639_v10  ;;  %70 = vst.msk [vmem:[#allocation2 + $0x178] sm:$0xff] %vm22_vm0, %v3639_v10 }
  0x1a   :  { %71 = vst.msk [vmem:[#allocation2 + $0x180] sm:$0xff] %vm22_vm0, %v3639_v10  ;;  %72 = vst.msk [vmem:[#allocation2 + $0x188] sm:$0xff] %vm22_vm0, %v3639_v10 }
  0x1b   :  { %73 = vst.msk [vmem:[#allocation2 + $0x190] sm:$0xff] %vm22_vm0, %v3639_v10  ;;  %74 = vst.msk [vmem:[#allocation2 + $0x198] sm:$0xff] %vm22_vm0, %v3639_v10 }
  0x1c   :  { %75 = vst.msk [vmem:[#allocation2 + $0x1a0] sm:$0xff] %vm22_vm0, %v3639_v10  ;;  %76 = vst.msk [vmem:[#allocation2 + $0x1a8] sm:$0xff] %vm22_vm0, %v3639_v10 }
  0x1d   :  { %77 = vst.msk [vmem:[#allocation2 + $0x1b0] sm:$0xff] %vm22_vm0, %v3639_v10  ;;  %78 = vst.msk [vmem:[#allocation2 + $0x1b8] sm:$0xff] %vm22_vm0, %v3639_v10 }
  0x1e   :  { %79 = vst.msk [vmem:[#allocation2 + $0x1c0] sm:$0xff] %vm22_vm0, %v3639_v10  ;;  %80 = vst.msk [vmem:[#allocation2 + $0x1c8] sm:$0xff] %vm22_vm0, %v3639_v10 }
  0x1f   :  { %81 = vst.msk [vmem:[#allocation2 + $0x1d0] sm:$0xff] %vm22_vm0, %v3639_v10  ;;  %82 = vst.msk [vmem:[#allocation2 + $0x1d8] sm:$0xff] %vm22_vm0, %v3639_v10 }
  0x20   :  { %83 = vst.msk [vmem:[#allocation2 + $0x1e0] sm:$0xff] %vm22_vm0, %v3639_v10  ;;  %84 = vst.msk [vmem:[#allocation2 + $0x1e8] sm:$0xff] %vm22_vm0, %v3639_v10 }
  0x21   :  { %85 = vst.msk [vmem:[#allocation2 + $0x1f0] sm:$0xff] %vm22_vm0, %v3639_v10  ;;  %86 = vst.msk [vmem:[#allocation2 + $0x1f8] sm:$0xff] %vm22_vm0, %v3639_v10 }
  0x22   :  { %9 = vsyncpa [#allocation4], 0  ;;  %3497 = vmatpush3.bf16.msra.mxu0 %v3682_v6  ;;  %v95_v20 = vrot.slane %v91_v19, %v3828_v11  ;;  %v109_v21 = vrot.slane %v91_v19, %v3838_v14  ;;  %v123_v22 = vrot.slane %v91_v19, %v3841_v15  ;;  %3595 = vmatpush3.bf16.msra.mxu1 %v3682_v6  ;;  %v1088_v24 = vld [vmem:[%s4703_s1 + $0x40] sm:$0xff]  ;;  %v1089_v25 = vld [vmem:[%s4703_s1 + $0x48] sm:$0xff]  ;;  %v3640_v29 = vmov 1966171168  }
  0x23   :  { %3499 = vmatprep.subr.bf16.mxu0 %v3498_v12  ;;  %v3502_v23 = vpack.c.bf16 %v1087_v17, %v1086_v16  ;;  %3588 = vmatprep.subr.bf16.mxu1 %v3498_v12  ;;  %v137_v30 = vunpack.c.l.s4 %v3640_v29  ;;  %v3506_v33 = vpack.c.bf16 %v1089_v25, %v1088_v24  ;;  %v1090_v34 = vld [vmem:[%s4703_s1 + $0x50] sm:$0xff]  ;;  %v1091_v35 = vld [vmem:[%s4703_s1 + $0x58] sm:$0xff]  ;;  %v1092_v45 = vld [vmem:[%s4703_s1 + $0x60] sm:$0xff]  ;;  %vm1919_vm8 = vcmask 1041408  }
  0x24   :  { %v96_v26 = vsub.f32 %v95_v20, %v3851_v18  ;;  %v110_v27 = vsub.f32 %v109_v21, %v3851_v18  ;;  %v124_v28 = vsub.f32 %v123_v22, %v3851_v18  ;;  %v3510_v43 = vpack.c.bf16 %v1091_v35, %v1090_v34  ;;  %v1093_v46 = vld [vmem:[%s4703_s1 + $0x68] sm:$0xff]  ;;  %v1094_v54 = vld [vmem:[%s4703_s1 + $0x70] sm:$0xff]  ;;  %v1095_v55 = vld [vmem:[%s4703_s1 + $0x78] sm:$0xff] }
  0x25   :  { %v138_v40 = vunpack.c.0.s8 %v137_v30  ;;  %v3514_v53 = vpack.c.bf16 %v1093_v46, %v1092_v45  ;;  %v3518_v61 = vpack.c.bf16 %v1095_v55, %v1094_v54  ;;  %vm2036_vm10 = vcmp.eq.s32.totalorder %v3694_v9, 2 }
  0x26   :  { %3501 = vmatpush3.bf16.msra.mxu0 %v3498_v12  ;;  %v97_v31 = vand.u32 2147483647, %v96_v26  ;;  %v111_v32 = vand.u32 2147483647, %v110_v27  ;;  %3596 = vmatpush3.bf16.msra.mxu1 %v3498_v12  ;;  %v3873_v39 = vand.u32 2147483647, %v124_v28 }
  0x27   :  { %3503 = vmatprep.subr.bf16.mxu0 %v3502_v23  ;;  %3589 = vmatprep.subr.bf16.mxu1 %v3502_v23  ;;  %v3883_v51 = vsub.s32 %v138_v40, %v3694_v9 }
  0x28   :  { %v98_v36 = vsub.f32 1.5, %v97_v31  ;;  %v101_v37 = vmul.f32 %v97_v31, %v97_v31  ;;  %v112_v38 = vsub.f32 1.5, %v111_v32  ;;  %v115_v44 = vmul.f32 %v111_v32, %v111_v32 }
  0x29   :  { %v126_v50 = vsub.f32 1.5, %v3873_v39  ;;  %vm100_vm1 = vcmp.lt.f32.partialorder %v97_v31, 0.5  ;;  %vm114_vm2 = vcmp.lt.f32.partialorder %v111_v32, 0.5  ;;  %v129_v1 = vmul.f32 %v3873_v39, %v3873_v39 }
  0x2a   :  { %3505 = vmatpush3.bf16.msra.mxu0 %v3502_v23  ;;  %v99_v41 = vmax.f32 %v98_v36, 0.0  ;;  %v113_v42 = vmax.f32 %v112_v38, 0.0  ;;  %3597 = vmatpush3.bf16.msra.mxu1 %v3502_v23  ;;  %v102_v47 = vsub.f32 0.75, %v101_v37  ;;  %v116_v57 = vsub.f32 0.75, %v115_v44 }
  0x2b   :  { %3507 = vmatprep.subr.bf16.mxu0 %v3506_v33  ;;  %3590 = vmatprep.subr.bf16.mxu1 %v3506_v33  ;;  %v127_v59 = vmax.f32 %v126_v50, 0.0  ;;  %v130_v7 = vsub.f32 0.75, %v129_v1  ;;  %vm128_vm3 = vcmp.lt.f32.partialorder %v3873_v39, 0.5 }
  0x2c   :  { %v103_v48 = vmul.f32 %v99_v41, %v99_v41  ;;  %v117_v49 = vmul.f32 %v113_v42, %v113_v42 }
  0x2d   :  { %v131_v2 = vmul.f32 %v127_v59, %v127_v59 }
  0x2e   :  { %3509 = vmatpush3.bf16.msra.mxu0 %v3506_v33  ;;  %v104_v52 = vmul.f32 0.5, %v103_v48  ;;  %3598 = vmatpush3.bf16.msra.mxu1 %v3506_v33  ;;  %v118_v58 = vmul.f32 0.5, %v117_v49 }
  0x2f   :  { %3511 = vmatprep.subr.bf16.mxu0 %v3510_v43  ;;  %3591 = vmatprep.subr.bf16.mxu1 %v3510_v43  ;;  %v132_v8 = vmul.f32 0.5, %v131_v2 }
  0x30   :  { %v3891_v56 = vsel %vm100_vm1, %v102_v47, %v104_v52  ;;  %v3896_v0 = vsel %vm114_vm2, %v116_v57, %v118_v58 }
  0x31   :  { %v142_v60 = vrot.slane %v3891_v56, %v3883_v51  ;;  %v3912_v21 = vsel %vm128_vm3, %v130_v7, %v132_v8  ;;  %v135_v48 = vcombine.high %v3891_v56, %v3891_v56 }
  0x32   :  { %3513 = vmatpush3.bf16.msra.mxu0 %v3510_v43  ;;  %3599 = vmatpush3.bf16.msra.mxu1 %v3510_v43 }
  0x33   :  { %3515 = vmatprep.subr.bf16.mxu0 %v3514_v53  ;;  %v150_v62 = vcombine.high %v142_v60, %v142_v60  ;;  %v158_v63 = vrot.slane %v142_v60, %v3883_v51  ;;  %3592 = vmatprep.subr.bf16.mxu1 %v3514_v53  ;;  %v149_v60 = vrot.slane %v135_v48, %v3883_v51 }
  0x35   :  { %v187_v3 = vrot.slane %v158_v63, %v3828_v11  ;;  %v3902_v4 = vrot.slane %v150_v62, %v3883_v51  ;;  %v180_v26 = vcombine.high %v158_v63, %v158_v63  ;;  %v165_v8 = vrot.slane %v149_v60, %v3883_v51 }
  0x36   :  { %3517 = vmatpush3.bf16.msra.mxu0 %v3514_v53  ;;  %3600 = vmatpush3.bf16.msra.mxu1 %v3514_v53 }
  0x37   :  { %3519 = vmatprep.subr.bf16.mxu0 %v3518_v61  ;;  %v224_v5 = vmul.f32 %v187_v3, %v3896_v0  ;;  %v191_v6 = vrot.slane %v3902_v4, %v3828_v11  ;;  %3593 = vmatprep.subr.bf16.mxu1 %v3518_v61  ;;  %v195_v40 = vrot.slane %v180_v26, %v3828_v11 }
  0x38   :  { %v182_v56 = vcombine.high %v3902_v4, %v3902_v4 }
  0x39   :  { %v240_v12 = vcombine.high %v224_v5, %v224_v5  ;;  %v247_v13 = vrot.slane %v224_v5, %v3883_v51  ;;  %v225_v16 = vmul.f32 %v191_v6, %v3896_v0  ;;  %v226_v49 = vmul.f32 %v195_v40, %v3896_v0 }
  0x3a   :  { %3521 = vmatpush3.bf16.msra.mxu0 %v3518_v61  ;;  %3601 = vmatpush3.bf16.msra.mxu1 %v3518_v61  ;;  %v199_v4 = vrot.slane %v182_v56, %v3828_v11  ;;  %v151_v6 = vcombine.high %v149_v60, %v149_v60 }
  0x3b   :  { %v255_v17 = vcombine.high %v247_v13, %v247_v13  ;;  %v263_v19 = vrot.slane %v247_v13, %v3883_v51  ;;  %v254_v20 = vrot.slane %v240_v12, %v3883_v51  ;;  %v296_v28 = vrot.slane %v225_v16, %v3883_v51 }
  0x3c   :  { %v289_v39 = vcombine.high %v225_v16, %v225_v16  ;;  %v345_v59 = vrot.slane %v226_v49, %v3883_v51 }
  0x3d   :  { %v285_v22 = vcombine.high %v263_v19, %v263_v19  ;;  %v635_v23 = vrot.slane %v263_v19, %v3828_v11  ;;  %v277_v24 = vrot.slane %v255_v17, %v3883_v51  ;;  %v270_v25 = vrot.slane %v254_v20, %v3883_v51 }
  0x3e   :  { %v256_v27 = vcombine.high %v254_v20, %v254_v20  ;;  %v304_v44 = vcombine.high %v296_v28, %v296_v28  ;;  %v312_v47 = vrot.slane %v296_v28, %v3883_v51  ;;  %v303_v54 = vrot.slane %v289_v39, %v3883_v51 }
  0x3f   :  { %v952_v29 = vmul.f32 %v635_v23, %v3912_v21  ;;  %v639_v30 = vrot.slane %v277_v24, %v3828_v11  ;;  %v643_v31 = vrot.slane %v285_v22, %v3828_v11  ;;  %v287_v32 = vcombine.high %v277_v24, %v277_v24 }
  0x40   :  { %v651_v33 = vrot.slane %v270_v25, %v3828_v11  ;;  %v284_v34 = vrot.slane %v256_v27, %v3883_v51  ;;  %v286_v35 = vcombine.high %v270_v25, %v270_v25  ;;  %v326_v53 = vrot.slane %v304_v44, %v3883_v51 }
  0x41   :  { %3394 = vmatprep.mubr.f32.mxu0 %v952_v29  ;;  %v953_v36 = vmul.f32 %v639_v30, %v3912_v21  ;;  %v954_v37 = vmul.f32 %v643_v31, %v3912_v21  ;;  %v647_v38 = vrot.slane %v287_v32, %v3828_v11  ;;  %v667_v57 = vrot.slane %v312_v47, %v3828_v11 }
  0x42   :  { %v655_v42 = vrot.slane %v284_v34, %v3828_v11  ;;  %v288_v43 = vcombine.high %v284_v34, %v284_v34  ;;  %v956_v45 = vmul.f32 %v651_v33, %v3912_v21  ;;  %v659_v46 = vrot.slane %v286_v35, %v3828_v11 }
  0x43   :  { %3395 = vmatmul.mubr.f32.vlgmr.msra.gmra.mrb[0].mxu0 %v953_v36  ;;  %v955_v41 = vmul.f32 %v647_v38, %v3912_v21  ;;  %v334_v58 = vcombine.high %v312_v47, %v312_v47  ;;  %v671_v62 = vrot.slane %v326_v53, %v3828_v11  ;;  %v336_v63 = vcombine.high %v326_v53, %v326_v53 }
  0x44   :  { %3397 = vmatprep.mubr.f32.mxu0 %v954_v37  ;;  %v957_v50 = vmul.f32 %v655_v42, %v3912_v21  ;;  %v663_v52 = vrot.slane %v288_v43, %v3828_v11  ;;  %v958_v55 = vmul.f32 %v659_v46, %v3912_v21  ;;  %v305_v1 = vcombine.high %v303_v54, %v303_v54 }
  0x45   :  { %v960_v2 = vmul.f32 %v667_v57, %v3912_v21  ;;  %v675_v3 = vrot.slane %v334_v58, %v3828_v11  ;;  %v319_v5 = vrot.slane %v303_v54, %v3883_v51  ;;  %v353_v7 = vcombine.high %v345_v59, %v345_v59 }
  0x46   :  { %v959_v61 = vmul.f32 %v663_v52, %v3912_v21  ;;  %v961_v12 = vmul.f32 %v671_v62, %v3912_v21  ;;  %v679_v13 = vrot.slane %v336_v63, %v3828_v11  ;;  %v333_v16 = vrot.slane %v305_v1, %v3883_v51 }
  0x47   :  { %3398 = vmatmul.mubr.f32.gmra.mrb[2].mxu0 %v955_v41  ;;  %v338_v17 = vcombine.high %v226_v49, %v226_v49  ;;  %v962_v19 = vmul.f32 %v675_v3, %v3912_v21  ;;  %v683_v20 = vrot.slane %v319_v5, %v3828_v11  ;;  %v335_v22 = vcombine.high %v319_v5, %v319_v5 }
  0x48   :  { %3400 = vmatprep.mubr.f32.mxu0 %v956_v45  ;;  %v361_v23 = vrot.slane %v345_v59, %v3883_v51  ;;  %v227_v24 = vmul.f32 %v199_v4, %v3896_v0  ;;  %v3960_v25 = vrot.slane %v151_v6, %v3883_v51  ;;  %v375_v26 = vrot.slane %v353_v7, %v3883_v51 }
  0x49   :  { %v203_v28 = vrot.slane %v165_v8, %v3828_v11  ;;  %v963_v29 = vmul.f32 %v679_v13, %v3912_v21  ;;  %v687_v30 = vrot.slane %v333_v16, %v3828_v11  ;;  %v337_v31 = vcombine.high %v333_v16, %v333_v16 }
  0x4a   :  { %v383_v27 = vcombine.high %v361_v23, %v361_v23  ;;  %v352_v32 = vrot.slane %v338_v17, %v3883_v51  ;;  %v964_v33 = vmul.f32 %v683_v20, %v3912_v21  ;;  %v691_v34 = vrot.slane %v335_v22, %v3828_v11 }
  0x4b   :  { %3401 = vmatmul.mubr.f32.gmra.mrb[4].mxu0 %v957_v50  ;;  %v385_v35 = vcombine.high %v375_v26, %v375_v26  ;;  %v394_v36 = vrot.slane %v227_v24, %v3883_v51  ;;  %v207_v37 = vrot.slane %v3960_v25, %v3828_v11  ;;  %v181_v38 = vcombine.high %v165_v8, %v165_v8 }
  0x4c   :  { %3403 = vmatprep.mubr.f32.mxu0 %v958_v55  ;;  %v699_v39 = vrot.slane %v361_v23, %v3828_v11  ;;  %v703_v40 = vrot.slane %v375_v26, %v3828_v11  ;;  %v707_v41 = vrot.slane %v383_v27, %v3828_v11  ;;  %v965_v42 = vmul.f32 %v687_v30, %v3912_v21 }
  0x4d   :  { %v695_v43 = vrot.slane %v337_v31, %v3828_v11  ;;  %v368_v44 = vrot.slane %v352_v32, %v3883_v51  ;;  %v3979_v45 = vmul.f32 %v203_v28, %v3896_v0  ;;  %v966_v46 = vmul.f32 %v691_v34, %v3912_v21 }
  0x4e   :  { %v711_v47 = vrot.slane %v385_v35, %v3828_v11  ;;  %v354_v48 = vcombine.high %v352_v32, %v352_v32  ;;  %v410_v49 = vrot.slane %v394_v36, %v3883_v51  ;;  %v387_v50 = vcombine.high %v227_v24, %v227_v24 }
  0x4f   :  { %3404 = vmatmul.mubr.f32.gmra.mrb[6].mxu0 %v959_v61  ;;  %v229_v52 = vmul.f32 %v207_v37, %v3896_v0  ;;  %v211_v53 = vrot.slane %v181_v38, %v3828_v11  ;;  %v968_v54 = vmul.f32 %v699_v39, %v3912_v21  ;;  %v969_v55 = vmul.f32 %v703_v40, %v3912_v21 }
  0x50   :  { %3406 = vmatprep.mubr.f32.mxu0 %v960_v2  ;;  %v970_v57 = vmul.f32 %v707_v41, %v3912_v21  ;;  %v402_v58 = vcombine.high %v394_v36, %v394_v36  ;;  %v967_v56 = vmul.f32 %v695_v43, %v3912_v21  ;;  %v715_v59 = vrot.slane %v368_v44, %v3828_v11 }
  0x51   :  { %v3993_v60 = vrot.slane %v3979_v45, %v3883_v51  ;;  %v492_v61 = vrot.slane %v229_v52, %v3883_v51  ;;  %v971_v62 = vmul.f32 %v711_v47, %v3912_v21  ;;  %v382_v63 = vrot.slane %v354_v48, %v3883_v51 }
  0x52   :  { %v485_v1 = vcombine.high %v229_v52, %v229_v52  ;;  %v3999_v2 = vmul.f32 %v211_v53, %v3896_v0  ;;  %v384_v3 = vcombine.high %v368_v44, %v368_v44  ;;  %v731_v5 = vrot.slane %v410_v49, %v3828_v11 }
  0x53   :  { %3407 = vmatmul.mubr.f32.gmra.mrb[8].mxu0 %v961_v12  ;;  %v4003_v4 = vrot.slane %v387_v50, %v3883_v51  ;;  %v500_v6 = vcombine.high %v492_v61, %v492_v61  ;;  %v4006_v7 = vrot.slane %v402_v58, %v3883_v51  ;;  %v432_v8 = vcombine.high %v410_v49, %v410_v49 }
  0x54   :  { %3409 = vmatprep.mubr.f32.mxu0 %v962_v19  ;;  %v4009_v12 = vrot.slane %v492_v61, %v3883_v51  ;;  %v499_v13 = vrot.slane %v485_v1, %v3883_v51  ;;  %v972_v16 = vmul.f32 %v715_v59, %v3912_v21  ;;  %v4015_v17 = vrot.slane %v3993_v60, %v3883_v51 }
  0x55   :  { %v4018_v19 = vrot.slane %v500_v6, %v3883_v51  ;;  %v541_v20 = vrot.slane %v3999_v2, %v3883_v51  ;;  %v719_v22 = vrot.slane %v382_v63, %v3828_v11  ;;  %v723_v27 = vrot.slane %v384_v3, %v3828_v11 }
  0x56   :  { %v530_v23 = vcombine.high %v4009_v12, %v4009_v12  ;;  %v515_v24 = vrot.slane %v499_v13, %v3883_v51  ;;  %v501_v26 = vcombine.high %v499_v13, %v499_v13  ;;  %v386_v28 = vcombine.high %v382_v63, %v382_v63 }
  0x57   :  { %3410 = vmatmul.mubr.f32.gmra.mrb[10].mxu0 %v963_v29  ;;  %v4028_v29 = vmul.f32 %v731_v5, %v3912_v21  ;;  %v532_v30 = vcombine.high %v4018_v19, %v4018_v19  ;;  %v735_v31 = vrot.slane %v4006_v7, %v3828_v11  ;;  %v739_v35 = vrot.slane %v432_v8, %v3828_v11 }
  0x58   :  { %3412 = vmatprep.mubr.f32.mxu0 %v964_v33  ;;  %v803_v32 = vrot.slane %v530_v23, %v3828_v11  ;;  %v811_v33 = vrot.slane %v515_v24, %v3828_v11  ;;  %v529_v34 = vrot.slane %v501_v26, %v3883_v51  ;;  %v531_v37 = vcombine.high %v515_v24, %v515_v24 }
  0x59   :  { %v807_v36 = vrot.slane %v532_v30, %v3828_v11  ;;  %v557_v38 = vrot.slane %v541_v20, %v3883_v51  ;;  %v973_v43 = vmul.f32 %v719_v22, %v3912_v21  ;;  %v434_v44 = vcombine.high %v4006_v7, %v4006_v7 }
  0x5a   :  { %v994_v39 = vmul.f32 %v803_v32, %v3912_v21  ;;  %v996_v40 = vmul.f32 %v811_v33, %v3912_v21  ;;  %v815_v41 = vrot.slane %v529_v34, %v3828_v11  ;;  %v819_v47 = vrot.slane %v531_v37, %v3828_v11 }
  0x5b   :  { %3413 = vmatmul.mubr.f32.gmra.mrb[12].mxu0 %v965_v42  ;;  %v533_v42 = vcombine.high %v529_v34, %v529_v34  ;;  %v974_v48 = vmul.f32 %v723_v27, %v3912_v21  ;;  %v727_v49 = vrot.slane %v386_v28, %v3828_v11  ;;  %v549_v52 = vcombine.high %v541_v20, %v541_v20 }
  0x5c   :  { %3415 = vmatprep.mubr.f32.mxu0 %v966_v46  ;;  %v995_v46 = vmul.f32 %v807_v36, %v3912_v21  ;;  %3457 = vmatprep.mubr.f32.mxu1 %v994_v39  ;;  %v417_v53 = vrot.slane %v4003_v4, %v3883_v51  ;;  %v827_v58 = vrot.slane %v557_v38, %v3828_v11 }
  0x5d   :  { %v823_v50 = vrot.slane %v533_v42, %v3828_v11  ;;  %v743_v59 = vrot.slane %v434_v44, %v3828_v11  ;;  %v403_v61 = vcombine.high %v4003_v4, %v4003_v4  ;;  %v183_v63 = vcombine.high %v3960_v25, %v3960_v25 }
  0x5e   :  { %3458 = vmatmul.mubr.f32.vlgmr.msra.gmra.mrb[0].mxu1 %v995_v46  ;;  %v975_v1 = vmul.f32 %v727_v49, %v3912_v21  ;;  %v747_v25 = vrot.slane %v417_v53, %v3828_v11  ;;  %v1000_v13 = vmul.f32 %v827_v58, %v3912_v21  ;;  %v978_v24 = vmul.f32 %v739_v35, %v3912_v21 }
  0x5f   :  { %3416 = vmatmul.mubr.f32.gmra.mrb[14].mxu0 %v967_v56  ;;  %3460 = vmatprep.mubr.f32.mxu1 %v996_v40  ;;  %v571_v56 = vrot.slane %v549_v52, %v3883_v51  ;;  %v999_v3 = vmul.f32 %v823_v50, %v3912_v21  ;;  %v215_v4 = vrot.slane %v183_v63, %v3828_v11 }
  0x60   :  { %3418 = vmatprep.mubr.f32.mxu0 %v968_v54  ;;  %v997_v54 = vmul.f32 %v815_v41, %v3912_v21  ;;  %v979_v26 = vmul.f32 %v743_v59, %v3912_v21  ;;  %v431_v27 = vrot.slane %v403_v61, %v3883_v51  ;;  %v980_v35 = vmul.f32 %v747_v25, %v3912_v21 }
  0x61   :  { %v581_v6 = vcombine.high %v571_v56, %v571_v56  ;;  %v831_v7 = vrot.slane %v571_v56, %v3828_v11  ;;  %v231_v23 = vmul.f32 %v215_v4, %v3896_v0  ;;  %v451_v37 = vcombine.high %v3993_v60, %v3993_v60 }
  0x62   :  { %3461 = vmatmul.mubr.f32.gmra.mrb[2].mxu1 %v997_v54  ;;  %v751_v39 = vrot.slane %v431_v27, %v3828_v11  ;;  %v435_v40 = vcombine.high %v431_v27, %v431_v27  ;;  %v481_v50 = vcombine.high %v4015_v17, %v4015_v17 }
  0x63   :  { %3419 = vmatmul.mubr.f32.gmra.mrb[16].mxu0 %v969_v55  ;;  %v579_v55 = vcombine.high %v557_v38, %v557_v38  ;;  %v839_v28 = vrot.slane %v581_v6, %v3828_v11  ;;  %v1001_v30 = vmul.f32 %v831_v7, %v3912_v21  ;;  %v590_v34 = vrot.slane %v231_v23, %v3883_v51 }
  0x64   :  { %3421 = vmatprep.mubr.f32.mxu0 %v970_v57  ;;  %v998_v57 = vmul.f32 %v819_v47, %v3912_v21  ;;  %v436_v38 = vcombine.high %v3979_v45, %v3979_v45  ;;  %v583_v44 = vcombine.high %v231_v23, %v231_v23  ;;  %v473_v49 = vrot.slane %v451_v37, %v3883_v51 }
  0x65   :  { %v835_v5 = vrot.slane %v579_v55, %v3828_v11  ;;  %v606_v45 = vrot.slane %v590_v34, %v3883_v51  ;;  %v981_v52 = vmul.f32 %v751_v39, %v3912_v21 }
  0x66   :  { %3463 = vmatprep.mubr.f32.mxu1 %v998_v57  ;;  %v450_v54 = vrot.slane %v436_v38, %v3883_v51  ;;  %v597_v56 = vrot.slane %v583_v44, %v3883_v51  ;;  %v767_v63 = vrot.slane %v473_v49, %v3828_v11 }
  0x67   :  { %3422 = vmatmul.mubr.f32.gmra.mrb[18].mxu0 %v971_v62  ;;  %v534_v62 = vcombine.high %v3999_v2, %v3999_v2  ;;  %v977_v2 = vmul.f32 %v735_v31, %v3912_v21  ;;  %3464 = vmatmul.mubr.f32.gmra.mrb[4].mxu1 %v999_v3  ;;  %v1002_v31 = vmul.f32 %v835_v5, %v3912_v21 }
  0x68   :  { %3424 = vmatprep.mubr.f32.mxu0 %v972_v16  ;;  %v433_v16 = vcombine.high %v417_v53, %v417_v53  ;;  %3466 = vmatprep.mubr.f32.mxu1 %v1000_v13  ;;  %v759_v53 = vrot.slane %v435_v40, %v3828_v11  ;;  %v859_v59 = vrot.slane %v606_v45, %v3828_v11 }
  0x69   :  { %v548_v8 = vrot.slane %v534_v62, %v3883_v51  ;;  %v628_v61 = vcombine.high %v606_v45, %v606_v45  ;;  %v483_v3 = vcombine.high %v473_v49, %v473_v49  ;;  %v466_v6 = vrot.slane %v450_v54, %v3883_v51 }
  0x6a   :  { %v755_v36 = vrot.slane %v433_v16, %v3828_v11  ;;  %v983_v5 = vmul.f32 %v759_v53, %v3912_v21  ;;  %v452_v7 = vcombine.high %v450_v54, %v450_v54  ;;  %v599_v25 = vcombine.high %v597_v56, %v597_v56 }
  0x6b   :  { %3425 = vmatmul.mubr.f32.gmra.mrb[20].mxu0 %v973_v43  ;;  %v564_v20 = vrot.slane %v548_v8, %v3883_v51  ;;  %v550_v22 = vcombine.high %v548_v8, %v548_v8  ;;  %3467 = vmatmul.mubr.f32.gmra.mrb[6].mxu1 %v1001_v30  ;;  %v598_v43 = vcombine.high %v590_v34, %v590_v34 }
  0x6c   :  { %3427 = vmatprep.mubr.f32.mxu0 %v974_v48  ;;  %3469 = vmatprep.mubr.f32.mxu1 %v1002_v31  ;;  %v982_v47 = vmul.f32 %v755_v36, %v3912_v21  ;;  %v763_v48 = vrot.slane %v4015_v17, %v3828_v11  ;;  %v1008_v13 = vmul.f32 %v859_v59, %v3912_v21 }
  0x6d   :  { %v578_v32 = vrot.slane %v550_v22, %v3883_v51  ;;  %v843_v0 = vrot.slane %v564_v20, %v3828_v11  ;;  %v580_v33 = vcombine.high %v564_v20, %v564_v20  ;;  %v620_v58 = vrot.slane %v598_v43, %v3883_v51 }
  0x6e   :  { %v984_v62 = vmul.f32 %v763_v48, %v3912_v21  ;;  %v867_v16 = vrot.slane %v628_v61, %v3828_v11  ;;  %v613_v20 = vrot.slane %v597_v56, %v3883_v51  ;;  %v985_v22 = vmul.f32 %v767_v63, %v3912_v21  ;;  %v1018_v61 = vld [vmem:[#allocation2 + $0x10] sm:$0xff] }
  0x6f   :  { %3428 = vmatmul.mubr.f32.gmra.mrb[22].mxu0 %v975_v1  ;;  %v582_v41 = vcombine.high %v578_v32, %v578_v32  ;;  %v847_v42 = vrot.slane %v578_v32, %v3828_v11  ;;  %v1004_v46 = vmul.f32 %v843_v0, %v3912_v21  ;;  %v851_v60 = vrot.slane %v580_v33, %v3828_v11 }
  0x70   :  { %3430 = vmatprep.mubr.f32.mxu0 %v4028_v29  ;;  %v1003_v29 = vmul.f32 %v839_v28, %v3912_v21  ;;  %v771_v1 = vrot.slane %v481_v50, %v3828_v11  ;;  %v863_v4 = vrot.slane %v620_v58, %v3828_v11  ;;  %v480_v27 = vrot.slane %v452_v7, %v3883_v51 }
  0x71   :  { %v855_v55 = vrot.slane %v582_v41, %v3828_v11  ;;  %v1005_v57 = vmul.f32 %v847_v42, %v3912_v21  ;;  %v1006_v17 = vmul.f32 %v851_v60, %v3912_v21  ;;  %v482_v28 = vcombine.high %v466_v6, %v466_v6 }
  0x72   :  { %3470 = vmatmul.mubr.f32.gmra.mrb[8].mxu1 %v1003_v29  ;;  %v986_v23 = vmul.f32 %v771_v1, %v3912_v21  ;;  %v1009_v30 = vmul.f32 %v863_v4, %v3912_v21  ;;  %v627_v32 = vrot.slane %v599_v25, %v3883_v51  ;;  %v1010_v0 = vmul.f32 %v867_v16, %v3912_v21 }
  0x73   :  { %3431 = vmatmul.mubr.f32.gmra.mrb[24].mxu0 %v977_v2  ;;  %3472 = vmatprep.mubr.f32.mxu1 %v1004_v46  ;;  %v1007_v8 = vmul.f32 %v855_v55, %v3912_v21  ;;  %v630_v2 = vcombine.high %v620_v58, %v620_v58  ;;  %v875_v33 = vrot.slane %v613_v20, %v3828_v11 }
  0x74   :  { %3433 = vmatprep.mubr.f32.mxu0 %v978_v24  ;;  %v775_v24 = vrot.slane %v483_v3, %v3828_v11  ;;  %v629_v34 = vcombine.high %v613_v20, %v613_v20  ;;  %v783_v37 = vrot.slane %v480_v27, %v3828_v11  ;;  %v484_v38 = vcombine.high %v480_v27, %v480_v27  ;;  %v1024_v27 = vld [vmem:[#allocation2 + $0x40] sm:$0xff] }
  0x75   :  { %v871_v31 = vrot.slane %v630_v2, %v3828_v11  ;;  %v879_v40 = vrot.slane %v627_v32, %v3828_v11  ;;  %v631_v29 = vcombine.high %v627_v32, %v627_v32  ;;  %v787_v41 = vrot.slane %v482_v28, %v3828_v11  ;;  %v1023_v2 = vld [vmem:[#allocation2 + $0x38] sm:$0xff]  ;;  %v2119_v32 = vld [vmem:[%s4704_s2] sm:$0x7] }
  0x76   :  { %3473 = vmatmul.mubr.f32.gmra.mrb[10].mxu1 %v1005_v57  ;;  %v1012_v42 = vmul.f32 %v875_v33, %v3912_v21  ;;  %v883_v43 = vrot.slane %v629_v34, %v3828_v11  ;;  %v989_v44 = vmul.f32 %v783_v37, %v3912_v21  ;;  %v791_v46 = vrot.slane %v484_v38, %v3828_v11  ;;  %v1016_v57 = vld [vmem:[#allocation2] sm:$0xff]  ;;  %v1027_v33 = vld [vmem:[#allocation2 + $0x58] sm:$0xff] }
  0x77   :  { %3434 = vmatmul.mubr.f32.gmra.mrb[26].mxu0 %v979_v26  ;;  %3475 = vmatprep.mubr.f32.mxu1 %v1006_v17  ;;  %v779_v26 = vrot.slane %v466_v6, %v3828_v11  ;;  %v1011_v39 = vmul.f32 %v871_v31, %v3912_v21  ;;  %v1013_v60 = vmul.f32 %v879_v40, %v3912_v21  ;;  %v4165_v34 = vmul.f32 8.0, %v2119_v32 }
  0x78   :  { %3436 = vmatprep.mubr.f32.mxu0 %v980_v35  ;;  %v987_v35 = vmul.f32 %v775_v24, %v3912_v21  ;;  %v887_v45 = vrot.slane %v631_v29, %v3828_v11  ;;  %v795_v48 = vrot.slane %v4009_v12, %v3828_v11  ;;  %v1014_v49 = vmul.f32 %v883_v43, %v3912_v21  ;;  %v1017_v12 = vld [vmem:[#allocation2 + $0x8] sm:$0xff] }
  0x79   :  { %v988_v36 = vmul.f32 %v779_v26, %v3912_v21  ;;  %v991_v50 = vmul.f32 %v791_v46, %v3912_v21  ;;  %v1025_v24 = vld [vmem:[#allocation2 + $0x48] sm:$0xff]  ;;  %v2124_v38 = vrot.slane %v4165_v34, %v3828_v11 }
  0x7a   :  { %3476 = vmatmul.mubr.f32.gmra.mrb[12].mxu1 %v1007_v8  ;;  %v1015_v53 = vmul.f32 %v887_v45, %v3912_v21  ;;  %v992_v54 = vmul.f32 %v795_v48, %v3912_v21 }
  0x7b   :  { %3437 = vmatmul.mubr.f32.gmra.mrb[28].mxu0 %v981_v52  ;;  %3478 = vmatprep.mubr.f32.mxu1 %v1008_v13  ;;  %v799_v52 = vrot.slane %v4018_v19, %v3828_v11  ;;  %v1019_v19 = vld [vmem:[#allocation2 + $0x18] sm:$0xff]  ;;  %v1022_v13 = vld [vmem:[#allocation2 + $0x30] sm:$0xff] }
  0x7c   :  { %3439 = vmatprep.mubr.f32.mxu0 %v982_v47  ;;  %v990_v47 = vmul.f32 %v787_v41, %v3912_v21  ;;  %v1029_v41 = vld [vmem:[#allocation2 + $0x68] sm:$0xff] }
  0x7d   :  { %v993_v55 = vmul.f32 %v799_v52, %v3912_v21  ;;  %v1021_v21 = vld [vmem:[#allocation2 + $0x28] sm:$0xff] }
  0x7e   :  { %3479 = vmatmul.mubr.f32.gmra.mrb[14].mxu1 %v1009_v30 }
  0x7f   :  { %3440 = vmatmul.mubr.f32.gmra.mrb[30].mxu0 %v983_v5  ;;  %3481 = vmatprep.mubr.f32.mxu1 %v1010_v0  ;;  %v1020_v5 = vld [vmem:[#allocation2 + $0x20] sm:$0xff] }
  0x80   :  { %3442 = vmatprep.mubr.f32.mxu0 %v984_v62 }
  0x82   :  { %3482 = vmatmul.mubr.f32.gmra.mrb[16].mxu1 %v1011_v39 }
  0x83   :  { %3443 = vmatmul.mubr.f32.gmra.mrb[32].mxu0 %v985_v22  ;;  %3484 = vmatprep.mubr.f32.mxu1 %v1012_v42  ;;  %v2125_v42 = vsub.f32 %v2124_v38, %v3851_v18 }
  0x84   :  { %3445 = vmatprep.mubr.f32.mxu0 %v986_v23 }
  0x86   :  { %3485 = vmatmul.mubr.f32.gmra.mrb[18].mxu1 %v1013_v60  ;;  %v2126_v60 = vand.u32 2147483647, %v2125_v42  ;;  %v2152_v42 = vrot.slane %v4165_v34, %v3841_v15 }
  0x87   :  { %3446 = vmatmul.mubr.f32.gmra.mrb[34].mxu0 %v987_v35  ;;  %3487 = vmatprep.mubr.f32.mxu1 %v1014_v49  ;;  %v1031_v49 = vld [vmem:[#allocation2 + $0x78] sm:$0xff] }
  0x88   :  { %3448 = vmatprep.mubr.f32.mxu0 %v988_v36  ;;  %v1026_v36 = vld [vmem:[#allocation2 + $0x50] sm:$0xff]  ;;  %vm2129_vm4 = vcmp.lt.f32.partialorder %v2126_v60, 0.5 }
  0x8a   :  { %3488 = vmatmul.mubr.f32.gmra.mrb[20].mxu1 %v1015_v53  ;;  %v1030_v53 = vld [vmem:[#allocation2 + $0x70] sm:$0xff] }
  0x8b   :  { %3449 = vmatmul.mubr.f32.gmra.mrb[36].mxu0 %v989_v44  ;;  %v1028_v44 = vld [vmem:[#allocation2 + $0x60] sm:$0xff] }
  0x8c   :  { %3451 = vmatprep.mubr.f32.mxu0 %v990_v47 }
  0x8f   :  { %3452 = vmatmul.mubr.f32.gmra.mrb[38].mxu0 %v991_v50  ;;  %v2127_v50 = vsub.f32 1.5, %v2126_v60 }
  0x90   :  { %3454 = vmatprep.mubr.f32.mxu0 %v992_v54 }
  0x93   :  { %3455 = vmatmul.mubr.f32.gmra.mrb[40].mxu0 %v993_v55  ;;  %v2128_v55 = vmax.f32 %v2127_v50, 0.0  ;;  %v1039_v50 = vld [vmem:[#allocation2 + $0xb8] sm:$0xff] }
 0x116   :  { %v3396_v58 = vpop.f32.mrb[0].mxu0 }
 0x117   :  { %v1482_v56 = vadd.f32 %v3396_v58, %v1017_v12  ;;  %v1162_v17 = vpop.f32.mrb[1].mxu0  ;;  %v2138_v12 = vrot.slane %v4165_v34, %v3838_v14 }
 0x118   :  { %v1481_v59 = vadd.f32 %v1162_v17, %v1016_v57  ;;  %v1033_v17 = vld [vmem:[#allocation2 + $0x88] sm:$0xff] }
 0x119   :  { %1547 = vst.msk [vmem:[#allocation2 + $0x8] sm:$0xff] %vm22_vm0, %v1482_v56 }
 0x11a   :  { %1546 = vst.msk [vmem:[#allocation2] sm:$0xff] %vm22_vm0, %v1481_v59  ;;  %v3399_v62 = vpop.f32.mrb[2].mxu0  ;;  %v2130_v59 = vmul.f32 %v2126_v60, %v2126_v60 }
 0x11b   :  { %v1484_v63 = vadd.f32 %v3399_v62, %v1019_v19  ;;  %v1172_v1 = vpop.f32.mrb[3].mxu0  ;;  %v2132_v19 = vmul.f32 %v2128_v55, %v2128_v55 }
 0x11c   :  { %v1483_v3 = vadd.f32 %v1172_v1, %v1018_v61  ;;  %v2139_v61 = vsub.f32 %v2138_v12, %v3851_v18 }
 0x11d   :  { %1549 = vst.msk [vmem:[#allocation2 + $0x18] sm:$0xff] %vm22_vm0, %v1484_v63  ;;  %v1032_v63 = vld [vmem:[#allocation2 + $0x80] sm:$0xff] }
 0x11e   :  { %1548 = vst.msk [vmem:[#allocation2 + $0x10] sm:$0xff] %vm22_vm0, %v1483_v3  ;;  %v3402_v6 = vpop.f32.mrb[4].mxu0  ;;  %v2131_v3 = vsub.f32 0.75, %v2130_v59 }
 0x11f   :  { %v1486_v7 = vadd.f32 %v3402_v6, %v1021_v21  ;;  %v1182_v8 = vpop.f32.mrb[5].mxu0  ;;  %v2133_v21 = vmul.f32 0.5, %v2132_v19 }
 0x120   :  { %v1485_v4 = vadd.f32 %v1182_v8, %v1020_v5  ;;  %v1614_v26 = vld [vmem:[#allocation2 + $0x8] sm:$0xff]  ;;  %v4181_v5 = vand.u32 2147483647, %v2139_v61 }
 0x121   :  { %1551 = vst.msk [vmem:[#allocation2 + $0x28] sm:$0xff] %vm22_vm0, %v1486_v7  ;;  %v1613_v25 = vld [vmem:[#allocation2] sm:$0xff] }
 0x122   :  { %1550 = vst.msk [vmem:[#allocation2 + $0x20] sm:$0xff] %vm22_vm0, %v1485_v4  ;;  %v3405_v16 = vpop.f32.mrb[6].mxu0  ;;  %1677 = vxpose.xlu0.b32.start [1/16] (narrow) %v1613_v25, 16  ;;  %v1035_v4 = vld [vmem:[#allocation2 + $0x98] sm:$0xff]  ;;  %v4183_v25 = vsel %vm2129_vm4, %v2131_v3, %v2133_v21  ;;  %v2144_v38 = vmul.f32 %v4181_v5, %v4181_v5  ;;  %vm2143_vm5 = vcmp.lt.f32.partialorder %v4181_v5, 0.5 }
 0x123   :  { %v1488_v20 = vadd.f32 %v3405_v16, %v1023_v2  ;;  %v1192_v22 = vpop.f32.mrb[7].mxu0  ;;  %v1059_v2 = vld [vmem:[#allocation2 + $0x158] sm:$0xff] }
 0x124   :  { %v1487_v23 = vadd.f32 %v1192_v22, %v1022_v13  ;;  %v1616_v43 = vld [vmem:[#allocation2 + $0x18] sm:$0xff]  ;;  %v2141_v13 = vsub.f32 1.5, %v4181_v5  ;;  %v1058_v22 = vld [vmem:[#allocation2 + $0x150] sm:$0xff]  ;;  %v2145_v34 = vsub.f32 0.75, %v2144_v38 }
 0x125   :  { %1553 = vst.msk [vmem:[#allocation2 + $0x38] sm:$0xff] %vm22_vm0, %v1488_v20  ;;  %v1615_v35 = vld [vmem:[#allocation2 + $0x10] sm:$0xff]  ;;  %v1067_v38 = vld [vmem:[#allocation2 + $0x198] sm:$0xff] }
 0x126   :  { %1552 = vst.msk [vmem:[#allocation2 + $0x30] sm:$0xff] %vm22_vm0, %v1487_v23  ;;  %v3408_v28 = vpop.f32.mrb[8].mxu0  ;;  %1678 = vxpose.xlu0.b32.cont [2/16] (narrow) %v1614_v26, 16  ;;  %v1034_v20 = vld [vmem:[#allocation2 + $0x90] sm:$0xff]  ;;  %v4189_v23 = vrot.slane %v4183_v25, %v3883_v51 }
 0x127   :  { %v1490_v30 = vadd.f32 %v3408_v28, %v1025_v24  ;;  %v1202_v31 = vpop.f32.mrb[9].mxu0 }
 0x128   :  { %v1489_v0 = vadd.f32 %v1202_v31, %v1024_v27  ;;  %v1618_v62 = vld [vmem:[#allocation2 + $0x28] sm:$0xff]  ;;  %v2142_v27 = vmax.f32 %v2141_v13, 0.0 }
 0x129   :  { %1555 = vst.msk [vmem:[#allocation2 + $0x48] sm:$0xff] %vm22_vm0, %v1490_v30  ;;  %v1617_v52 = vld [vmem:[#allocation2 + $0x20] sm:$0xff] }
 0x12a   :  { %1554 = vst.msk [vmem:[#allocation2 + $0x40] sm:$0xff] %vm22_vm0, %v1489_v0  ;;  %v3411_v37 = vpop.f32.mrb[10].mxu0  ;;  %1679 = vxpose.xlu0.b32.cont [3/16] (narrow) %v1615_v35, 16  ;;  %v4194_v0 = vrot.slane %v4189_v23, %v3883_v51  ;;  %v1037_v35 = vld [vmem:[#allocation2 + $0xa8] sm:$0xff] }
 0x12b   :  { %v1492_v39 = vadd.f32 %v3411_v37, %v1027_v33  ;;  %v1212_v40 = vpop.f32.mrb[11].mxu0  ;;  %v1061_v37 = vld [vmem:[#allocation2 + $0x168] sm:$0xff] }
 0x12c   :  { %v1491_v29 = vadd.f32 %v1212_v40, %v1026_v36  ;;  %v1036_v40 = vld [vmem:[#allocation2 + $0xa0] sm:$0xff]  ;;  %v2216_v61 = vrot.slane %v4194_v0, %v3828_v11 }
 0x12d   :  { %1557 = vst.msk [vmem:[#allocation2 + $0x58] sm:$0xff] %vm22_vm0, %v1492_v39  ;;  %v1619_v16 = vld [vmem:[#allocation2 + $0x30] sm:$0xff]  ;;  %v1620_v39 = vld [vmem:[#allocation2 + $0x38] sm:$0xff] }
 0x12e   :  { %1556 = vst.msk [vmem:[#allocation2 + $0x50] sm:$0xff] %vm22_vm0, %v1491_v29  ;;  %v3414_v46 = vpop.f32.mrb[12].mxu0  ;;  %1680 = vxpose.xlu0.b32.cont [4/16] (narrow) %v1616_v43, 16  ;;  %v1060_v29 = vld [vmem:[#allocation2 + $0x160] sm:$0xff] }
 0x12f   :  { %v1494_v45 = vadd.f32 %v3414_v46, %v1029_v41  ;;  %v1222_v47 = vpop.f32.mrb[13].mxu0  ;;  %v2146_v41 = vmul.f32 %v2142_v27, %v2142_v27  ;;  %v2209_v46 = vcombine.high %v4194_v0, %v4194_v0 }
 0x130   :  { %v1493_v48 = vadd.f32 %v1222_v47, %v1028_v44 }
 0x131   :  { %1559 = vst.msk [vmem:[#allocation2 + $0x68] sm:$0xff] %vm22_vm0, %v1494_v45  ;;  %v3459_v26 = vpop.f32.mrb[0].mxu1  ;;  %v1621_v12 = vld [vmem:[#allocation2 + $0x40] sm:$0xff]  ;;  %v2224_v19 = vrot.slane %v2209_v46, %v3828_v11 }
 0x132   :  { %1558 = vst.msk [vmem:[#allocation2 + $0x60] sm:$0xff] %vm22_vm0, %v1493_v48  ;;  %v3417_v54 = vpop.f32.mrb[14].mxu0  ;;  %1681 = vxpose.xlu0.b32.cont [5/16] (narrow) %v1617_v52, 16  ;;  %v1524_v31 = vadd.f32 %v3459_v26, %v1059_v2  ;;  %v1372_v32 = vpop.f32.mrb[1].mxu1  ;;  %v1038_v52 = vld [vmem:[#allocation2 + $0xb0] sm:$0xff] }
 0x133   :  { %v1496_v57 = vadd.f32 %v3417_v54, %v1031_v49  ;;  %v1232_v58 = vpop.f32.mrb[15].mxu0  ;;  %v1523_v36 = vadd.f32 %v1372_v32, %v1058_v22  ;;  %v1063_v54 = vld [vmem:[#allocation2 + $0x178] sm:$0xff] }
 0x134   :  { %v1495_v56 = vadd.f32 %v1232_v58, %v1030_v53  ;;  %1589 = vst.msk [vmem:[#allocation2 + $0x158] sm:$0xff] %vm22_vm0, %v1524_v31  ;;  %v2147_v58 = vmul.f32 0.5, %v2146_v41  ;;  %v1066_v41 = vld [vmem:[#allocation2 + $0x190] sm:$0xff] }
 0x135   :  { %1561 = vst.msk [vmem:[#allocation2 + $0x78] sm:$0xff] %vm22_vm0, %v1496_v57  ;;  %1588 = vst.msk [vmem:[#allocation2 + $0x150] sm:$0xff] %vm22_vm0, %v1523_v36  ;;  %v3462_v44 = vpop.f32.mrb[2].mxu1  ;;  %v1062_v57 = vld [vmem:[#allocation2 + $0x170] sm:$0xff]  ;;  %v1043_v36 = vld [vmem:[#allocation2 + $0xd8] sm:$0xff] }
 0x136   :  { %1560 = vst.msk [vmem:[#allocation2 + $0x70] sm:$0xff] %vm22_vm0, %v1495_v56  ;;  %v3420_v1 = vpop.f32.mrb[16].mxu0  ;;  %1682 = vxpose.xlu0.b32.cont [6/16] (narrow) %v1618_v62, 16  ;;  %v1526_v47 = vadd.f32 %v3462_v44, %v1061_v37  ;;  %v1382_v48 = vpop.f32.mrb[3].mxu1  ;;  %v2153_v56 = vsub.f32 %v2152_v42, %v3851_v18  ;;  %v1040_v18 = vld [vmem:[#allocation2 + $0xc0] sm:$0xff] }
 0x137   :  { %v1498_v6 = vadd.f32 %v3420_v1, %v1033_v17  ;;  %v1242_v7 = vpop.f32.mrb[17].mxu0  ;;  %v1525_v53 = vadd.f32 %v1382_v48, %v1060_v29  ;;  %v1042_v29 = vld [vmem:[#allocation2 + $0xd0] sm:$0xff] }
 0x138   :  { %v1497_v8 = vadd.f32 %v1242_v7, %v1032_v63  ;;  %1591 = vst.msk [vmem:[#allocation2 + $0x168] sm:$0xff] %vm22_vm0, %v1526_v47  ;;  %v4219_v2 = vand.u32 2147483647, %v2153_v56 }
 0x139   :  { %1563 = vst.msk [vmem:[#allocation2 + $0x88] sm:$0xff] %vm22_vm0, %v1498_v6  ;;  %1590 = vst.msk [vmem:[#allocation2 + $0x160] sm:$0xff] %vm22_vm0, %v1525_v53  ;;  %v1041_v6 = vld [vmem:[#allocation2 + $0xc8] sm:$0xff] }
 0x13a   :  { %1562 = vst.msk [vmem:[#allocation2 + $0x80] sm:$0xff] %vm22_vm0, %v1497_v8  ;;  %1683 = vxpose.xlu0.b32.cont [7/16] (narrow) %v1619_v16, 16  ;;  %v3423_v24 = vpop.f32.mrb[18].mxu0  ;;  %v3465_v59 = vpop.f32.mrb[4].mxu1  ;;  %v1065_v8 = vld [vmem:[#allocation2 + $0x188] sm:$0xff]  ;;  %v2155_v26 = vsub.f32 1.5, %v4219_v2  ;;  %v2158_v27 = vmul.f32 %v4219_v2, %v4219_v2 }
 0x13b   :  { %v1500_v28 = vadd.f32 %v3423_v24, %v1035_v4  ;;  %v1252_v30 = vpop.f32.mrb[19].mxu0  ;;  %v1528_v1 = vadd.f32 %v3465_v59, %v1063_v54  ;;  %v1392_v3 = vpop.f32.mrb[5].mxu1  ;;  %v4217_v4 = vsel %vm2143_vm5, %v2145_v34, %v2147_v58  ;;  %v1622_v16 = vld [vmem:[#allocation2 + $0x48] sm:$0xff]  ;;  %vm2157_vm6 = vcmp.lt.f32.partialorder %v4219_v2, 0.5  ;;  %v1068_v59 = vld [vmem:[#allocation2 + $0x1a0] sm:$0xff] }
 0x13c   :  { %v1499_v33 = vadd.f32 %v1252_v30, %v1034_v20  ;;  %v1527_v7 = vadd.f32 %v1392_v3, %v1062_v57  ;;  %v1064_v20 = vld [vmem:[#allocation2 + $0x180] sm:$0xff]  ;;  %v4224_v22 = vmul.f32 %v2224_v19, %v4217_v4  ;;  %v2159_v46 = vsub.f32 0.75, %v2158_v27  ;;  %v1045_v34 = vld [vmem:[#allocation2 + $0xe8] sm:$0xff] }
 0x13d   :  { %1565 = vst.msk [vmem:[#allocation2 + $0x98] sm:$0xff] %vm22_vm0, %v1500_v28  ;;  %1593 = vst.msk [vmem:[#allocation2 + $0x178] sm:$0xff] %vm22_vm0, %v1528_v1  ;;  %v4232_v28 = vmul.f32 %v2216_v61, %v4217_v4  ;;  %v1069_v57 = vld [vmem:[#allocation2 + $0x1a8] sm:$0xff] }
 0x13e   :  { %1564 = vst.msk [vmem:[#allocation2 + $0x90] sm:$0xff] %vm22_vm0, %v1499_v33  ;;  %1684 = vxpose.xlu0.b32.cont [8/16] (narrow) %v1620_v39, 16  ;;  %v3426_v43 = vpop.f32.mrb[20].mxu0  ;;  %1592 = vst.msk [vmem:[#allocation2 + $0x170] sm:$0xff] %vm22_vm0, %v1527_v7  ;;  %v3468_v5 = vpop.f32.mrb[6].mxu1  ;;  %v2156_v39 = vmax.f32 %v2155_v26, 0.0  ;;  %v2374_v42 = vrot.slane %v4224_v22, %v3883_v51 }
 0x13f   :  { %v1502_v60 = vadd.f32 %v3426_v43, %v1037_v35  ;;  %v1262_v45 = vpop.f32.mrb[21].mxu0  ;;  %v1530_v0 = vadd.f32 %v3468_v5, %v1065_v8  ;;  %v1402_v33 = vpop.f32.mrb[7].mxu1  ;;  %v1071_v26 = vld [vmem:[#allocation2 + $0x1b8] sm:$0xff] }
 0x140   :  { %v1501_v49 = vadd.f32 %v1262_v45, %v1036_v40  ;;  %v1630_v13 = vld [vmem:[#allocation2 + $0x88] sm:$0xff]  ;;  %v1529_v37 = vadd.f32 %v1402_v33, %v1064_v20  ;;  %v1623_v40 = vld [vmem:[#allocation2 + $0x50] sm:$0xff]  ;;  %v2276_v45 = vrot.slane %v4232_v28, %v3883_v51  ;;  %v2390_v53 = vrot.slane %v2374_v42, %v3883_v51 }
 0x141   :  { %v1629_v55 = vld [vmem:[#allocation2 + $0x80] sm:$0xff]  ;;  %1567 = vst.msk [vmem:[#allocation2 + $0xa8] sm:$0xff] %vm22_vm0, %v1502_v60  ;;  %1595 = vst.msk [vmem:[#allocation2 + $0x188] sm:$0xff] %vm22_vm0, %v1530_v0  ;;  %v2160_v60 = vmul.f32 %v2156_v39, %v2156_v39 }
 0x142   :  { %1709 = vxpose.xlu1.b32.start [1/16] (narrow) %v1629_v55, 16  ;;  %1685 = vxpose.xlu0.b32.cont [9/16] (narrow) %v1621_v12, 16  ;;  %1566 = vst.msk [vmem:[#allocation2 + $0xa0] sm:$0xff] %vm22_vm0, %v1501_v49  ;;  %v3429_v17 = vpop.f32.mrb[22].mxu0  ;;  %1594 = vst.msk [vmem:[#allocation2 + $0x180] sm:$0xff] %vm22_vm0, %v1529_v37  ;;  %v1044_v55 = vld [vmem:[#allocation2 + $0xe0] sm:$0xff]  ;;  %v2728_v61 = vrot.slane %v2390_v53, %v3828_v11  ;;  %v2284_v3 = vcombine.high %v2276_v45, %v2276_v45 }
 0x143   :  { %v1504_v62 = vadd.f32 %v3429_v17, %v1039_v50  ;;  %v1272_v63 = vpop.f32.mrb[23].mxu0  ;;  %v2161_v58 = vmul.f32 0.5, %v2160_v60  ;;  %v1624_v17 = vld [vmem:[#allocation2 + $0x58] sm:$0xff]  ;;  %v2292_v27 = vrot.slane %v2276_v45, %v3883_v51  ;;  %v2412_v33 = vcombine.high %v2390_v53, %v2390_v53  ;;  %v1049_v45 = vld [vmem:[#allocation2 + $0x108] sm:$0xff] }
 0x144   :  { %v1503_v21 = vadd.f32 %v1272_v63, %v1038_v52  ;;  %v2382_v52 = vcombine.high %v2374_v42, %v2374_v42  ;;  %v1632_v56 = vld [vmem:[#allocation2 + $0x98] sm:$0xff]  ;;  %v2306_v2 = vrot.slane %v2284_v3, %v3883_v51 }
 0x145   :  { %1569 = vst.msk [vmem:[#allocation2 + $0xb8] sm:$0xff] %vm22_vm0, %v1504_v62  ;;  %v1631_v30 = vld [vmem:[#allocation2 + $0x90] sm:$0xff]  ;;  %v3471_v44 = vpop.f32.mrb[8].mxu1  ;;  %v4252_v1 = vsel %vm2157_vm6, %v2159_v46, %v2161_v58  ;;  %v2664_v39 = vrot.slane %v2292_v27, %v3828_v11 }
 0x146   :  { %1710 = vxpose.xlu1.b32.cont [2/16] (narrow) %v1630_v13, 16  ;;  %1686 = vxpose.xlu0.b32.cont [10/16] (narrow) %v1622_v16, 16  ;;  %1568 = vst.msk [vmem:[#allocation2 + $0xb0] sm:$0xff] %vm22_vm0, %v1503_v21  ;;  %v3432_v24 = vpop.f32.mrb[24].mxu0  ;;  %v1532_v49 = vadd.f32 %v3471_v44, %v1067_v38  ;;  %v1412_v50 = vpop.f32.mrb[9].mxu1  ;;  %v2404_v19 = vrot.slane %v2382_v52, %v3883_v51 }
 0x147   :  { %v1506_v31 = vadd.f32 %v3432_v24, %v1041_v6  ;;  %v1282_v32 = vpop.f32.mrb[25].mxu0  ;;  %v1531_v12 = vadd.f32 %v1412_v50, %v1066_v41  ;;  %v2997_v16 = vmul.f32 %v2728_v61, %v4252_v1  ;;  %v1047_v24 = vld [vmem:[#allocation2 + $0xf8] sm:$0xff]  ;;  %v2981_v50 = vmul.f32 %v2664_v39, %v4252_v1 }
 0x148   :  { %v1505_v35 = vadd.f32 %v1282_v32, %v1040_v18  ;;  %1597 = vst.msk [vmem:[#allocation2 + $0x198] sm:$0xff] %vm22_vm0, %v1532_v49  ;;  %v2732_v13 = vrot.slane %v2404_v19, %v3828_v11  ;;  %v1070_v32 = vld [vmem:[#allocation2 + $0x1b0] sm:$0xff]  ;;  %v1073_v49 = vld [vmem:[#allocation2 + $0x1c8] sm:$0xff] }
 0x149   :  { %1571 = vst.msk [vmem:[#allocation2 + $0xc8] sm:$0xff] %vm22_vm0, %v1506_v31  ;;  %1596 = vst.msk [vmem:[#allocation2 + $0x190] sm:$0xff] %vm22_vm0, %v1531_v12  ;;  %v3474_v63 = vpop.f32.mrb[10].mxu1  ;;  %v1633_v6 = vld [vmem:[#allocation2 + $0xa0] sm:$0xff]  ;;  %v1046_v31 = vld [vmem:[#allocation2 + $0xf0] sm:$0xff] }
 0x14a   :  { %1711 = vxpose.xlu1.b32.cont [3/16] (narrow) %v1631_v30, 16  ;;  %1687 = vxpose.xlu0.b32.cont [11/16] (narrow) %v1623_v40, 16  ;;  %1570 = vst.msk [vmem:[#allocation2 + $0xc0] sm:$0xff] %vm22_vm0, %v1505_v35  ;;  %v3435_v43 = vpop.f32.mrb[26].mxu0  ;;  %v1534_v7 = vadd.f32 %v3474_v63, %v1069_v57  ;;  %v1422_v8 = vpop.f32.mrb[11].mxu1  ;;  %v1625_v30 = vld [vmem:[#allocation2 + $0x60] sm:$0xff]  ;;  %v2998_v0 = vmul.f32 %v2732_v13, %v4252_v1 }
 0x14b   :  { %v1508_v47 = vadd.f32 %v3435_v43, %v1043_v36  ;;  %v1292_v48 = vpop.f32.mrb[27].mxu0  ;;  %v1533_v5 = vadd.f32 %v1422_v8, %v1068_v59  ;;  %v2414_v35 = vcombine.high %v2404_v19, %v2404_v19  ;;  %v2367_v36 = vcombine.high %v4224_v22, %v4224_v22  ;;  %v1634_v53 = vld [vmem:[#allocation2 + $0xa8] sm:$0xff]  ;;  %v1051_v8 = vld [vmem:[#allocation2 + $0x118] sm:$0xff] }
 0x14c   :  { %v1507_v54 = vadd.f32 %v1292_v48, %v1042_v29  ;;  %1599 = vst.msk [vmem:[#allocation2 + $0x1a8] sm:$0xff] %vm22_vm0, %v1534_v7  ;;  %v2668_v40 = vrot.slane %v2306_v2, %v3828_v11  ;;  %v2314_v29 = vcombine.high %v2292_v27, %v2292_v27  ;;  %v3522_v46 = vpack.c.bf16 %v2998_v0, %v2997_v16  ;;  %v1075_v16 = vld [vmem:[#allocation2 + $0x1d8] sm:$0xff] }
 0x14d   :  { %1573 = vst.msk [vmem:[#allocation2 + $0xd8] sm:$0xff] %vm22_vm0, %v1508_v47  ;;  %1598 = vst.msk [vmem:[#allocation2 + $0x1a0] sm:$0xff] %vm22_vm0, %v1533_v5  ;;  %v3477_v38 = vpop.f32.mrb[12].mxu1  ;;  %v2736_v22 = vrot.slane %v2412_v33, %v3828_v11  ;;  %v1048_v47 = vld [vmem:[#allocation2 + $0x100] sm:$0xff]  ;;  %v2316_v57 = vcombine.high %v2306_v2, %v2306_v2  ;;  %v2381_v19 = vrot.slane %v2367_v36, %v3883_v51  ;;  %v1635_v63 = vld [vmem:[#allocation2 + $0xb0] sm:$0xff] }
 0x14e   :  { %1712 = vxpose.xlu1.b32.cont [4/16] (narrow) %v1632_v56, 16  ;;  %1688 = vxpose.xlu0.b32.cont [12/16] (narrow) %v1624_v17, 16  ;;  %1572 = vst.msk [vmem:[#allocation2 + $0xd0] sm:$0xff] %vm22_vm0, %v1507_v54  ;;  %v3438_v62 = vpop.f32.mrb[28].mxu0  ;;  %v1536_v43 = vadd.f32 %v3477_v38, %v1071_v26  ;;  %v1432_v44 = vpop.f32.mrb[13].mxu1  ;;  %v2982_v52 = vmul.f32 %v2668_v40, %v4252_v1  ;;  %v1626_v54 = vld [vmem:[#allocation2 + $0x68] sm:$0xff] }
 0x14f   :  { %v1510_v21 = vadd.f32 %v3438_v62, %v1045_v34  ;;  %v1302_v18 = vpop.f32.mrb[29].mxu0  ;;  %v1535_v48 = vadd.f32 %v1432_v44, %v1070_v32  ;;  %v1072_v34 = vld [vmem:[#allocation2 + $0x1c0] sm:$0xff]  ;;  %3523 = vmatprep.subr.bf16.mxu1 %v3522_v46  ;;  %v2999_v12 = vmul.f32 %v2736_v22, %v4252_v1  ;;  %v2672_v58 = vrot.slane %v2314_v29, %v3828_v11  ;;  %v1050_v5 = vld [vmem:[#allocation2 + $0x110] sm:$0xff]  ;;  %v1077_v46 = vld [vmem:[#allocation2 + $0x1e8] sm:$0xff] }
 0x150   :  { %v1509_v20 = vadd.f32 %v1302_v18, %v1044_v55  ;;  %1601 = vst.msk [vmem:[#allocation2 + $0x1b8] sm:$0xff] %vm22_vm0, %v1536_v43  ;;  %v2740_v55 = vrot.slane %v2414_v35, %v3828_v11  ;;  %v3524_v59 = vpack.c.bf16 %v2982_v52, %v2981_v50  ;;  %v2676_v18 = vrot.slane %v2316_v57, %v3828_v11  ;;  %v1074_v26 = vld [vmem:[#allocation2 + $0x1d0] sm:$0xff]  ;;  %v1052_v43 = vld [vmem:[#allocation2 + $0x120] sm:$0xff] }
 0x151   :  { %1575 = vst.msk [vmem:[#allocation2 + $0xe8] sm:$0xff] %vm22_vm0, %v1510_v21  ;;  %1600 = vst.msk [vmem:[#allocation2 + $0x1b0] sm:$0xff] %vm22_vm0, %v1535_v48  ;;  %v3480_v17 = vpop.f32.mrb[14].mxu1  ;;  %v2269_v33 = vcombine.high %v4232_v28, %v4232_v28  ;;  %v2179_v35 = vcombine.high %v4189_v23, %v4189_v23  ;;  %v1636_v23 = vld [vmem:[#allocation2 + $0xb8] sm:$0xff] }
 0x152   :  { %1713 = vxpose.xlu1.b32.cont [5/16] (narrow) %v1633_v6, 16  ;;  %1689 = vxpose.xlu0.b32.cont [13/16] (narrow) %v1625_v30, 16  ;;  %1574 = vst.msk [vmem:[#allocation2 + $0xe0] sm:$0xff] %vm22_vm0, %v1509_v20  ;;  %v3441_v37 = vpop.f32.mrb[30].mxu0  ;;  %v1538_v3 = vadd.f32 %v3480_v17, %v1073_v49  ;;  %v1442_v21 = vpop.f32.mrb[15].mxu1  ;;  %v3000_v6 = vmul.f32 %v2740_v55, %v4252_v1 }
 0x153   :  { %v1512_v41 = vadd.f32 %v3441_v37, %v1047_v24  ;;  %v1312_v42 = vpop.f32.mrb[31].mxu0  ;;  %v1537_v13 = vadd.f32 %v1442_v21, %v1072_v34  ;;  %3525 = vmatpush3.bf16.msra.mxu1 %v3524_v59  ;;  %v2983_v20 = vmul.f32 %v2672_v58, %v4252_v1  ;;  %v1627_v24 = vld [vmem:[#allocation2 + $0x70] sm:$0xff]  ;;  %v2984_v2 = vmul.f32 %v2676_v18, %v4252_v1 }
 0x154   :  { %v1511_v60 = vadd.f32 %v1312_v42, %v1046_v31  ;;  %1603 = vst.msk [vmem:[#allocation2 + $0x1c8] sm:$0xff] %vm22_vm0, %v1538_v3  ;;  %v3526_v27 = vpack.c.bf16 %v3000_v6, %v2999_v12  ;;  %v2383_v30 = vcombine.high %v2381_v19, %v2381_v19  ;;  %v2397_v31 = vrot.slane %v2381_v19, %v3883_v51  ;;  %v1053_v42 = vld [vmem:[#allocation2 + $0x128] sm:$0xff]  ;;  %v1637_v12 = vld [vmem:[#allocation2 + $0xc0] sm:$0xff]  ;;  %v1079_v3 = vld [vmem:[#allocation2 + $0x1f8] sm:$0xff] }
 0x155   :  { %1577 = vst.msk [vmem:[#allocation2 + $0xf8] sm:$0xff] %vm22_vm0, %v1512_v41  ;;  %1602 = vst.msk [vmem:[#allocation2 + $0x1c0] sm:$0xff] %vm22_vm0, %v1537_v13  ;;  %v3483_v0 = vpop.f32.mrb[16].mxu1  ;;  %v3528_v40 = vpack.c.bf16 %v2984_v2, %v2983_v20  ;;  %v2283_v28 = vrot.slane %v2269_v33, %v3883_v51  ;;  %v4298_v50 = vrot.slane %v2179_v35, %v3883_v51 }
 0x156   :  { %1576 = vst.msk [vmem:[#allocation2 + $0xf0] sm:$0xff] %vm22_vm0, %v1511_v60  ;;  %v3444_v56 = vpop.f32.mrb[32].mxu0  ;;  %1714 = vxpose.xlu1.b32.cont [6/16] (narrow) %v1634_v53, 16  ;;  %1690 = vxpose.xlu0.b32.cont [14/16] (narrow) %v1626_v54, 16  ;;  %v1540_v38 = vadd.f32 %v3483_v0, %v1075_v16  ;;  %v1452_v39 = vpop.f32.mrb[17].mxu1  ;;  %v2411_v29 = vrot.slane %v2383_v30, %v3883_v51  ;;  %v1628_v60 = vld [vmem:[#allocation2 + $0x78] sm:$0xff] }
 0x157   :  { %v1514_v61 = vadd.f32 %v3444_v56, %v1049_v45  ;;  %v1322_v62 = vpop.f32.mrb[33].mxu0  ;;  %3527 = vmatprep.subr.bf16.mxu1 %v3526_v27  ;;  %v1539_v44 = vadd.f32 %v1452_v39, %v1074_v26  ;;  %v2744_v22 = vrot.slane %v2397_v31, %v3828_v11  ;;  %v1076_v45 = vld [vmem:[#allocation2 + $0x1e0] sm:$0xff]  ;;  %v2413_v48 = vcombine.high %v2397_v31, %v2397_v31  ;;  %v1057_v39 = vld [vmem:[#allocation2 + $0x148] sm:$0xff] }
 0x158   :  { %v1513_v7 = vadd.f32 %v1322_v62, %v1048_v47  ;;  %1605 = vst.msk [vmem:[#allocation2 + $0x1d8] sm:$0xff] %vm22_vm0, %v1540_v38  ;;  %3529 = vmatpush3.bf16.msra.mxu1 %v3528_v40  ;;  %v2748_v47 = vrot.slane %v2411_v29, %v3828_v11  ;;  %v2415_v49 = vcombine.high %v2411_v29, %v2411_v29  ;;  %v1055_v62 = vld [vmem:[#allocation2 + $0x138] sm:$0xff] }
 0x159   :  { %1579 = vst.msk [vmem:[#allocation2 + $0x108] sm:$0xff] %vm22_vm0, %v1514_v61  ;;  %1604 = vst.msk [vmem:[#allocation2 + $0x1d0] sm:$0xff] %vm22_vm0, %v1539_v44  ;;  %v3486_v53 = vpop.f32.mrb[18].mxu1  ;;  %v3001_v54 = vmul.f32 %v2744_v22, %v4252_v1  ;;  %v2285_v34 = vcombine.high %v2283_v28, %v2283_v28  ;;  %v2299_v55 = vrot.slane %v2283_v28, %v3883_v51 }
 0x15a   :  { %1578 = vst.msk [vmem:[#allocation2 + $0x100] sm:$0xff] %vm22_vm0, %v1513_v7  ;;  %1715 = vxpose.xlu1.b32.cont [7/16] (narrow) %v1635_v63, 16  ;;  %1691 = vxpose.xlu0.b32.cont [15/16] (narrow) %v1627_v24, 16  ;;  %v3447_v32 = vpop.f32.mrb[34].mxu0  ;;  %v1542_v56 = vadd.f32 %v3486_v53, %v1077_v46  ;;  %v1462_v17 = vpop.f32.mrb[19].mxu1  ;;  %v3002_v59 = vmul.f32 %v2748_v47, %v4252_v1  ;;  %v1054_v7 = vld [vmem:[#allocation2 + $0x130] sm:$0xff] }
 0x15b   :  { %v1516_v36 = vadd.f32 %v3447_v32, %v1051_v8  ;;  %v1332_v37 = vpop.f32.mrb[35].mxu0  ;;  %v2752_v19 = vrot.slane %v2413_v48, %v3828_v11  ;;  %v1541_v63 = vadd.f32 %v1462_v17, %v1076_v45  ;;  %v2313_v21 = vrot.slane %v2285_v34, %v3883_v51  ;;  %v1078_v8 = vld [vmem:[#allocation2 + $0x1f0] sm:$0xff] }
 0x15c   :  { %v1515_v41 = vadd.f32 %v1332_v37, %v1050_v5  ;;  %v2680_v6 = vrot.slane %v2299_v55, %v3828_v11  ;;  %1607 = vst.msk [vmem:[#allocation2 + $0x1e8] sm:$0xff] %vm22_vm0, %v1542_v56  ;;  %v3530_v13 = vpack.c.bf16 %v3002_v59, %v3001_v54  ;;  %v2756_v16 = vrot.slane %v2415_v49, %v3828_v11  ;;  %v1639_v47 = vld [vmem:[#allocation2 + $0xd0] sm:$0xff] }
 0x15d   :  { %1581 = vst.msk [vmem:[#allocation2 + $0x118] sm:$0xff] %vm22_vm0, %v1516_v36  ;;  %v3003_v20 = vmul.f32 %v2752_v19, %v4252_v1  ;;  %v2315_v24 = vcombine.high %v2299_v55, %v2299_v55  ;;  %1606 = vst.msk [vmem:[#allocation2 + $0x1e0] sm:$0xff] %vm22_vm0, %v1541_v63  ;;  %v3489_v26 = vpop.f32.mrb[20].mxu1  ;;  %v2684_v27 = vrot.slane %v2313_v21, %v3828_v11 }
 0x15e   :  { %1716 = vxpose.xlu1.b32.cont [8/16] (narrow) %v1636_v23, 16  ;;  %1692 = vxpose.xlu0.b32.end [16/16] (narrow) %v1628_v60, 16  ;;  %1580 = vst.msk [vmem:[#allocation2 + $0x110] sm:$0xff] %vm22_vm0, %v1515_v41  ;;  %v3450_v52 = vpop.f32.mrb[36].mxu0  ;;  %v2985_v2 = vmul.f32 %v2680_v6, %v4252_v1  ;;  %v2317_v30 = vcombine.high %v2313_v21, %v2313_v21  ;;  %v1472_v35 = vpop.f32.mrb[21].mxu1 }
 0x15f   :  { %v1518_v57 = vadd.f32 %v3450_v52, %v1053_v42  ;;  %v1342_v58 = vpop.f32.mrb[37].mxu0  ;;  %v1544_v33 = vadd.f32 %v3489_v26, %v1079_v3  ;;  %3531 = vmatprep.subr.bf16.mxu1 %v3530_v13  ;;  %v3004_v36 = vmul.f32 %v2756_v16, %v4252_v1  ;;  %v2688_v37 = vrot.slane %v2315_v24, %v3828_v11  ;;  %v1638_v42 = vld [vmem:[#allocation2 + $0xc8] sm:$0xff]  ;;  %v1641_v13 = vld [vmem:[#allocation2 + $0xe0] sm:$0xff] }
 0x160   :  { %v1517_v61 = vadd.f32 %v1342_v58, %v1052_v43  ;;  %v1646_v31 = vld [vmem:[#allocation2 + $0x108] sm:$0xff]  ;;  %v1543_v40 = vadd.f32 %v1472_v35, %v1078_v8  ;;  %v2986_v29 = vmul.f32 %v2684_v27, %v4252_v1  ;;  %v2692_v41 = vrot.slane %v2317_v30, %v3828_v11  ;;  %v1056_v43 = vld [vmem:[#allocation2 + $0x140] sm:$0xff] }
 0x161   :  { %v1645_v18 = vld [vmem:[#allocation2 + $0x100] sm:$0xff]  ;;  %1583 = vst.msk [vmem:[#allocation2 + $0x128] sm:$0xff] %vm22_vm0, %v1518_v57  ;;  %1609 = vst.msk [vmem:[#allocation2 + $0x1f8] sm:$0xff] %vm22_vm0, %v1544_v33  ;;  %v3534_v44 = vpack.c.bf16 %v3004_v36, %v3003_v20  ;;  %v2987_v46 = vmul.f32 %v2688_v37, %v4252_v1  ;;  %v2211_v22 = vcombine.high %v4298_v50, %v4298_v50 }
 0x162   :  { %1717 = vxpose.xlu1.b32.cont [9/16] (narrow) %v1637_v12, 16  ;;  %1741 = vxpose.xlu0.b32.start [1/16] (narrow) %v1645_v18, 16  ;;  %1582 = vst.msk [vmem:[#allocation2 + $0x120] sm:$0xff] %vm22_vm0, %v1517_v61  ;;  %v3453_v5 = vpop.f32.mrb[38].mxu0  ;;  %v2220_v28 = vrot.slane %v4298_v50, %v3828_v11  ;;  %1608 = vst.msk [vmem:[#allocation2 + $0x1f0] sm:$0xff] %vm22_vm0, %v1543_v40  ;;  %v3532_v60 = vpack.c.bf16 %v2986_v29, %v2985_v2 }
 0x163   :  { %v1520_v32 = vadd.f32 %v3453_v5, %v1055_v62  ;;  %v1352_v0 = vpop.f32.mrb[39].mxu0  ;;  %v2988_v45 = vmul.f32 %v2692_v41, %v4252_v1  ;;  %v2228_v53 = vrot.slane %v2211_v22, %v3828_v11  ;;  %v1640_v62 = vld [vmem:[#allocation2 + $0xd8] sm:$0xff] }
 0x164   :  { %v1519_v38 = vadd.f32 %v1352_v0, %v1054_v7  ;;  %v2254_v54 = vmul.f32 %v2220_v28, %v4217_v4  ;;  %3533 = vmatpush3.bf16.msra.mxu1 %v3532_v60  ;;  %v1648_v58 = vld [vmem:[#allocation2 + $0x118] sm:$0xff]  ;;  %v1642_v28 = vld [vmem:[#allocation2 + $0xe8] sm:$0xff] }
 0x165   :  { %1585 = vst.msk [vmem:[#allocation2 + $0x138] sm:$0xff] %vm22_vm0, %v1520_v32  ;;  %v1647_v48 = vld [vmem:[#allocation2 + $0x110] sm:$0xff]  ;;  %v3536_v50 = vpack.c.bf16 %v2988_v45, %v2987_v46  ;;  %3535 = vmatprep.subr.bf16.mxu1 %v3534_v44  ;;  %v2256_v55 = vmul.f32 %v2228_v53, %v4217_v4 }
 0x166   :  { %1718 = vxpose.xlu1.b32.cont [10/16] (narrow) %v1638_v42, 16  ;;  %1742 = vxpose.xlu0.b32.cont [2/16] (narrow) %v1646_v31, 16  ;;  %1584 = vst.msk [vmem:[#allocation2 + $0x130] sm:$0xff] %vm22_vm0, %v1519_v38  ;;  %v3456_v23 = vpop.f32.mrb[40].mxu0  ;;  %v2325_v12 = vrot.slane %v2254_v54, %v3883_v51  ;;  %v2318_v57 = vcombine.high %v2254_v54, %v2254_v54  ;;  %v1643_v53 = vld [vmem:[#allocation2 + $0xf0] sm:$0xff] }
 0x167   :  { %v1522_v49 = vadd.f32 %v3456_v23, %v1057_v39  ;;  %v1362_v52 = vpop.f32.mrb[41].mxu0  ;;  %v2423_v56 = vrot.slane %v2256_v55, %v3883_v51  ;;  %v2416_v19 = vcombine.high %v2256_v55, %v2256_v55 }
 0x168   :  { %v1521_v34 = vadd.f32 %v1362_v52, %v1056_v43  ;;  %v2333_v17 = vcombine.high %v2325_v12, %v2325_v12  ;;  %v2341_v59 = vrot.slane %v2325_v12, %v3883_v51  ;;  %3537 = vmatpush3.bf16.msra.mxu1 %v3536_v50  ;;  %v2332_v61 = vrot.slane %v2318_v57, %v3883_v51  ;;  %v1650_v39 = vld [vmem:[#allocation2 + $0x128] sm:$0xff] }
 0x169   :  { %1587 = vst.msk [vmem:[#allocation2 + $0x148] sm:$0xff] %vm22_vm0, %v1522_v49  ;;  %v2431_v63 = vcombine.high %v2423_v56, %v2423_v56  ;;  %v2439_v3 = vrot.slane %v2423_v56, %v3883_v51  ;;  %v2430_v7 = vrot.slane %v2416_v19, %v3883_v51  ;;  %v1649_v16 = vld [vmem:[#allocation2 + $0x120] sm:$0xff] }
 0x16a   :  { %1719 = vxpose.xlu1.b32.cont [11/16] (narrow) %v1639_v47, 16  ;;  %1743 = vxpose.xlu0.b32.cont [3/16] (narrow) %v1647_v48, 16  ;;  %1586 = vst.msk [vmem:[#allocation2 + $0x140] sm:$0xff] %vm22_vm0, %v1521_v34  ;;  %v2355_v21 = vrot.slane %v2333_v17, %v3883_v51  ;;  %v2696_v6 = vrot.slane %v2341_v59, %v3828_v11 }
 0x16b   :  { %v2363_v18 = vcombine.high %v2341_v59, %v2341_v59  ;;  %v2334_v8 = vcombine.high %v2332_v61, %v2332_v61  ;;  %v2453_v20 = vrot.slane %v2431_v63, %v3883_v51  ;;  %v2760_v24 = vrot.slane %v2439_v3, %v3828_v11 }
 0x16c   :  { %v2700_v5 = vrot.slane %v2355_v21, %v3828_v11  ;;  %v2989_v26 = vmul.f32 %v2696_v6, %v4252_v1  ;;  %v2461_v27 = vcombine.high %v2439_v3, %v2439_v3  ;;  %v2365_v2 = vcombine.high %v2355_v21, %v2355_v21  ;;  %v1652_v21 = vld [vmem:[#allocation2 + $0x138] sm:$0xff] }
 0x16d   :  { %v2704_v30 = vrot.slane %v2363_v18, %v3828_v11  ;;  %v2432_v31 = vcombine.high %v2430_v7, %v2430_v7  ;;  %v2764_v32 = vrot.slane %v2453_v20, %v3828_v11  ;;  %v3005_v0 = vmul.f32 %v2760_v24, %v4252_v1  ;;  %v1651_v54 = vld [vmem:[#allocation2 + $0x130] sm:$0xff] }
 0x16e   :  { %1720 = vxpose.xlu1.b32.cont [12/16] (narrow) %v1640_v62, 16  ;;  %1744 = vxpose.xlu0.b32.cont [4/16] (narrow) %v1648_v58, 16  ;;  %v2990_v33 = vmul.f32 %v2700_v5, %v4252_v1  ;;  %v2463_v35 = vcombine.high %v2453_v20, %v2453_v20  ;;  %v2768_v36 = vrot.slane %v2461_v27, %v3828_v11  ;;  %v1644_v20 = vld [vmem:[#allocation2 + $0xf8] sm:$0xff]  ;;  %v1661_v27 = vld [vmem:[#allocation2 + $0x180] sm:$0xff] }
 0x16f   :  { %v2708_v37 = vrot.slane %v2365_v2, %v3828_v11  ;;  %v2991_v38 = vmul.f32 %v2704_v30, %v4252_v1  ;;  %v3006_v40 = vmul.f32 %v2764_v32, %v4252_v1  ;;  %v2446_v42 = vrot.slane %v2430_v7, %v3883_v51 }
 0x170   :  { %v3540_v29 = vpack.c.bf16 %v2990_v33, %v2989_v26  ;;  %v2772_v41 = vrot.slane %v2463_v35, %v3828_v11  ;;  %v3007_v43 = vmul.f32 %v2768_v36, %v4252_v1  ;;  %v2460_v46 = vrot.slane %v2432_v31, %v3883_v51  ;;  %v1654_v32 = vld [vmem:[#allocation2 + $0x148] sm:$0xff]  ;;  %v1663_v36 = vld [vmem:[#allocation2 + $0x190] sm:$0xff] }
 0x171   :  { %v2992_v44 = vmul.f32 %v2708_v37, %v4252_v1  ;;  %v2348_v22 = vrot.slane %v2332_v61, %v3883_v51  ;;  %v3538_v23 = vpack.c.bf16 %v3006_v40, %v3005_v0  ;;  %v2776_v45 = vrot.slane %v2446_v42, %v3828_v11  ;;  %v1653_v2 = vld [vmem:[#allocation2 + $0x140] sm:$0xff]  ;;  %v1662_v33 = vld [vmem:[#allocation2 + $0x188] sm:$0xff] }
 0x172   :  { %1721 = vxpose.xlu1.b32.cont [13/16] (narrow) %v1641_v13, 16  ;;  %1745 = vxpose.xlu0.b32.cont [5/16] (narrow) %v1649_v16, 16  ;;  %v3008_v60 = vmul.f32 %v2772_v41, %v4252_v1  ;;  %v2362_v47 = vrot.slane %v2334_v8, %v3883_v51  ;;  %v2780_v49 = vrot.slane %v2460_v46, %v3828_v11 }
 0x173   :  { %v3544_v48 = vpack.c.bf16 %v2992_v44, %v2991_v38  ;;  %v2712_v52 = vrot.slane %v2348_v22, %v3828_v11  ;;  %3539 = vmatprep.subr.bf16.mxu1 %v3538_v23  ;;  %v3009_v50 = vmul.f32 %v2776_v45, %v4252_v1  ;;  %v2462_v12 = vcombine.high %v2446_v42, %v2446_v42  ;;  %v1655_v38 = vld [vmem:[#allocation2 + $0x150] sm:$0xff]  ;;  %v1656_v44 = vld [vmem:[#allocation2 + $0x158] sm:$0xff] }
 0x174   :  { %v3542_v34 = vpack.c.bf16 %v3008_v60, %v3007_v43  ;;  %v2716_v55 = vrot.slane %v2362_v47, %v3828_v11  ;;  %3541 = vmatpush3.bf16.msra.mxu1 %v3540_v29  ;;  %v3010_v57 = vmul.f32 %v2780_v49, %v4252_v1  ;;  %v2464_v56 = vcombine.high %v2460_v46, %v2460_v46  ;;  %v1664_v43 = vld [vmem:[#allocation2 + $0x198] sm:$0xff] }
 0x175   :  { %v2993_v58 = vmul.f32 %v2712_v52, %v4252_v1  ;;  %v2364_v17 = vcombine.high %v2348_v22, %v2348_v22  ;;  %v2784_v19 = vrot.slane %v2462_v12, %v3828_v11  ;;  %v2366_v61 = vcombine.high %v2362_v47, %v2362_v47  ;;  %v1657_v47 = vld [vmem:[#allocation2 + $0x160] sm:$0xff]  ;;  %v1659_v12 = vld [vmem:[#allocation2 + $0x170] sm:$0xff] }
 0x176   :  { %1722 = vxpose.xlu1.b32.cont [14/16] (narrow) %v1642_v28, 16  ;;  %1746 = vxpose.xlu0.b32.cont [6/16] (narrow) %v1650_v39, 16  ;;  %v2994_v59 = vmul.f32 %v2716_v55, %v4252_v1  ;;  %v3546_v62 = vpack.c.bf16 %v3010_v57, %v3009_v50  ;;  %v2788_v63 = vrot.slane %v2464_v56, %v3828_v11  ;;  %v1665_v28 = vld [vmem:[#allocation2 + $0x1a0] sm:$0xff]  ;;  %v1667_v55 = vld [vmem:[#allocation2 + $0x1b0] sm:$0xff]  ;;  %v1668_v57 = vld [vmem:[#allocation2 + $0x1b8] sm:$0xff] }
 0x177   :  { %3543 = vmatprep.subr.bf16.mxu1 %v3542_v34  ;;  %v2720_v3 = vrot.slane %v2364_v17, %v3828_v11  ;;  %v3011_v6 = vmul.f32 %v2784_v19, %v4252_v1  ;;  %v2724_v18 = vrot.slane %v2366_v61, %v3828_v11  ;;  %v2164_v16 = vcombine.high %v4183_v25, %v4183_v25  ;;  %v1658_v34 = vld [vmem:[#allocation2 + $0x168] sm:$0xff]  ;;  %v1669_v56 = vld [vmem:[#allocation2 + $0x1c0] sm:$0xff] }
 0x178   :  { %3545 = vmatpush3.bf16.msra.mxu1 %v3544_v48  ;;  %v3548_v7 = vpack.c.bf16 %v2994_v59, %v2993_v58  ;;  %v3012_v8 = vmul.f32 %v2788_v63, %v4252_v1  ;;  %v1660_v58 = vld [vmem:[#allocation2 + $0x178] sm:$0xff]  ;;  %v1670_v17 = vld [vmem:[#allocation2 + $0x1c8] sm:$0xff]  ;;  %v1671_v59 = vld [vmem:[#allocation2 + $0x1d0] sm:$0xff] }
 0x179   :  { %v2995_v13 = vmul.f32 %v2720_v3, %v4252_v1  ;;  %3547 = vmatprep.subr.bf16.mxu1 %v3546_v62  ;;  %v2996_v24 = vmul.f32 %v2724_v18, %v4252_v1  ;;  %v4382_v26 = vrot.slane %v2164_v16, %v3883_v51  ;;  %v4415_v19 = vld [vmem:[%s4705_s3] sm:$0x77]  ;;  %v1672_v62 = vld [vmem:[#allocation2 + $0x1d8] sm:$0xff]  ;;  %v1873_v16 = vsub.s32 5, %v3694_v9 }
 0x17a   :  { %1723 = vxpose.xlu1.b32.cont [15/16] (narrow) %v1643_v53, 16  ;;  %1747 = vxpose.xlu0.b32.cont [7/16] (narrow) %v1651_v54, 16  ;;  %v3550_v5 = vpack.c.bf16 %v3012_v8, %v3011_v6  ;;  %v1666_v54 = vld [vmem:[#allocation2 + $0x1a8] sm:$0xff]  ;;  %v1673_v63 = vld [vmem:[#allocation2 + $0x1e0] sm:$0xff]  ;;  %v1807_v3 = vmul.f32 0.125, %v4415_v19  ;;  %v1675_v8 = vld [vmem:[#allocation2 + $0x1f0] sm:$0xff] }
 0x17b   :  { %v3552_v30 = vpack.c.bf16 %v2996_v24, %v2995_v13  ;;  %v4386_v31 = vrot.slane %v4382_v26, %v3883_v51  ;;  %v4421_v13 = vsub.s32 4, %v3694_v9  ;;  %vm2075_vm15 = vcmp.lt.f32.partialorder %v4415_v19, 2.0 }
 0x17c   :  { %3549 = vmatpush3.bf16.msra.mxu1 %v3548_v7  ;;  %v1814_v6 = vrot.slane %v1807_v3, %v3828_v11  ;;  %v1870_v18 = vrot.slane %v1807_v3, %v3838_v14  ;;  %v1674_v7 = vld [vmem:[#allocation2 + $0x1e8] sm:$0xff]  ;;  %vm2091_vm0 = vcmp.gt.f32.partialorder %v4415_v19, 5.0 }
 0x17d   :  { %3551 = vmatprep.subr.bf16.mxu1 %v3550_v5  ;;  %v2210_v25 = vcombine.high %v4386_v31, %v4386_v31 }
 0x17e   :  { %1724 = vxpose.xlu1.b32.end [16/16] (narrow) %v1644_v20, 16  ;;  %1748 = vxpose.xlu0.b32.cont [8/16] (narrow) %v1652_v21, 16  ;;  %v1834_v20 = vrot.slane %v1814_v6, %v3828_v11  ;;  %v1890_v24 = vrot.slane %v1870_v18, %v3838_v14 }
 0x17f   :  { %v2240_v0 = vrot.slane %v2210_v25, %v3828_v11 }
 0x180   :  { %3553 = vmatpush3.bf16.msra.mxu1 %v3552_v30  ;;  %v1874_v30 = vrot.slane %v1807_v3, %v1873_v16 }
 0x181   :  { %v4392_v35 = vmul.f32 %v2240_v0, %v4217_v4 }
 0x182   :  { %1773 = vxpose.xlu1.b32.start [1/16] (narrow) %v1661_v27, 16  ;;  %1749 = vxpose.xlu0.b32.cont [9/16] (narrow) %v1653_v2, 16  ;;  %v1943_v27 = vrot.slane %v1807_v3, %v3841_v15  ;;  %v1818_v2 = vrot.slane %v1807_v3, %v4421_v13 }
 0x183   :  { %v2570_v37 = vrot.slane %v4392_v35, %v3883_v51  ;;  %v2563_v18 = vcombine.high %v4392_v35, %v4392_v35 }
 0x185   :  { %v2578_v39 = vcombine.high %v2570_v37, %v2570_v37  ;;  %v2586_v40 = vrot.slane %v2570_v37, %v3883_v51  ;;  %v1963_v37 = vrot.slane %v1943_v27, %v3841_v15  ;;  %v2577_v35 = vrot.slane %v2563_v18, %v3883_v51 }
 0x186   :  { %1774 = vxpose.xlu1.b32.cont [2/16] (narrow) %v1662_v33, 16  ;;  %1750 = vxpose.xlu0.b32.cont [10/16] (narrow) %v1654_v32, 16  ;;  %v1676_v33 = vld [vmem:[#allocation2 + $0x1f8] sm:$0xff] }
 0x187   :  { %v2600_v29 = vrot.slane %v2578_v39, %v3883_v51  ;;  %v2856_v41 = vrot.slane %v2586_v40, %v3828_v11  ;;  %v2608_v42 = vcombine.high %v2586_v40, %v2586_v40  ;;  %v1894_v39 = vrot.slane %v1874_v30, %v3838_v14 }
 0x189   :  { %v2860_v46 = vrot.slane %v2600_v29, %v3828_v11  ;;  %v3029_v22 = vmul.f32 %v2856_v41, %v4252_v1  ;;  %v2610_v23 = vcombine.high %v2600_v29, %v2600_v29  ;;  %v2864_v60 = vrot.slane %v2608_v42, %v3828_v11 }
 0x18a   :  { %1775 = vxpose.xlu1.b32.cont [3/16] (narrow) %v1663_v36, 16  ;;  %1751 = vxpose.xlu0.b32.cont [11/16] (narrow) %v1655_v38, 16  ;;  %v1946_v36 = vsub.s32 6, %v3694_v9  ;;  %v1838_v38 = vrot.slane %v1818_v2, %v3828_v11  ;;  %v2232_v42 = vrot.slane %v4386_v31, %v3828_v11 }
 0x18b   :  { %v3030_v45 = vmul.f32 %v2860_v46, %v4252_v1  ;;  %v2868_v48 = vrot.slane %v2610_v23, %v3828_v11  ;;  %v4405_v49 = vmul.f32 %v2864_v60, %v4252_v1  ;;  %v3641_v60 = vmov 0  }
 0x18c   :  { %v2257_v31 = vmul.f32 %v2232_v42, %v4217_v4 }
 0x18d   :  { %v3554_v52 = vpack.c.bf16 %v3030_v45, %v3029_v22  ;;  %v4408_v53 = vmul.f32 %v2868_v48, %v4252_v1  ;;  %v2180_v22 = vcombine.high %v4382_v26, %v4382_v26 }
 0x18e   :  { %1776 = vxpose.xlu1.b32.cont [4/16] (narrow) %v1664_v43, 16  ;;  %1752 = vxpose.xlu0.b32.cont [12/16] (narrow) %v1656_v44, 16  ;;  %v1947_v44 = vrot.slane %v1807_v3, %v1946_v36 }
 0x18f   :  { %3555 = vmatprep.subr.bf16.mxu1 %v3554_v52  ;;  %v3558_v50 = vpack.c.bf16 %v4408_v53, %v4405_v49  ;;  %v4448_v26 = vrot.slane %v2180_v22, %v3883_v51 }
 0x192   :  { %1777 = vxpose.xlu1.b32.cont [5/16] (narrow) %v1665_v28, 16  ;;  %1753 = vxpose.xlu0.b32.cont [13/16] (narrow) %v1657_v47, 16 }
 0x196   :  { %1778 = vxpose.xlu1.b32.cont [6/16] (narrow) %v1666_v54, 16  ;;  %1754 = vxpose.xlu0.b32.cont [14/16] (narrow) %v1658_v34, 16  ;;  %v1967_v54 = vrot.slane %v1947_v44, %v3841_v15 }
 0x19a   :  { %1779 = vxpose.xlu1.b32.cont [7/16] (narrow) %v1667_v55, 16  ;;  %1755 = vxpose.xlu0.b32.cont [15/16] (narrow) %v1659_v12, 16 }
 0x19e   :  { %1780 = vxpose.xlu1.b32.cont [8/16] (narrow) %v1668_v57, 16  ;;  %1756 = vxpose.xlu0.b32.end [16/16] (narrow) %v1660_v58, 16 }
 0x1a2   :  { %1781 = vxpose.xlu1.b32.cont [9/16] (narrow) %v1669_v56, 16  ;;  %v1693_v61 = vpop.trf.xlu0 }
 0x1a3   :  { %v1847_v25 = vmul.f32 %v1834_v20, %v1693_v61  ;;  %v1903_v32 = vmul.f32 %v1890_v24, %v1693_v61 }
 0x1a5   :  { %v1855_v40 = vrot.slane %v1847_v25, 3  ;;  %v1920_v29 = vrot.slane %v1903_v32, 6  ;;  %v2212_v25 = vcombine.high %v4448_v26, %v4448_v26 }
 0x1a6   :  { %1782 = vxpose.xlu1.b32.cont [10/16] (narrow) %v1670_v17, 16  ;;  %v1694_v21 = vpop.trf.xlu0  ;;  %v4453_v17 = vld [vmem:[%s4705_s3 + $0x8] sm:$0x77]  ;;  %s3642_s3 = smov [#allocation3]  }
 0x1a7   :  { %vm1996_vm7 = vcmp.gt.f32.partialorder %v1694_v21, 0.0  ;;  %v1907_v0 = vmul.f32 %v1890_v24, %v1694_v21  ;;  %v1976_v46 = vmul.f32 %v1963_v37, %v1694_v21  ;;  %v1863_v23 = vadd.f32 %v1855_v40, %v1693_v61  ;;  %s3200_s27 = sshll.u32 %s3642_s3, 4  ;;  %s3201_s27 = int_to_ptr.vmem [resolvable:$true] %s3200_s27 }
 0x1a8   :  { %v2000_v5 = vsel %vm1996_vm7, %v1694_v21, 1.0  ;;  %v2039_v45 = vsel %vm1996_vm7, 1, %v3641_v60  ;;  %v2244_v44 = vrot.slane %v2212_v25, %v3828_v11  ;;  %s3615_s30 = scalar_lea.vmem %s3201_s27, 64  ;;  %p3620_p1 = scmp.lt.s32.totalorder %s3201_s27, %s3201_s27 }
 0x1a9   :  { %3606 = vrcp.f32 %v2000_v5  ;;  %v1921_v41 = vrot.slane %v1907_v0, 6  ;;  %v1984_v55 = vrot.slane %v1976_v46, 1  ;;  %v2046_v12 = vrot.slane %v2039_v45, %v4421_v13  ;;  %p3616_p0 = scmp.ne.s32.totalorder %s3201_s27, %s3615_s30  ;;  %p3621_p2 = scmp.lt.s32.totalorder %s3615_s30, %s3615_s30 }
 0x1aa   :  { %1783 = vxpose.xlu1.b32.cont [11/16] (narrow) %v1671_v59, 16 }
 0x1ab   :  { %v1922_v48 = vsel %vm1919_vm8, %v1920_v29, %v1921_v41  ;;  %vm2059_vm11 = vcmp.eq.s32.totalorder %v2046_v12, 1  ;;  %p3622_p3 = por %p3621_p2, %p3620_p1 }
 0x1ac   :  { %v1936_v56 = vadd.f32 %v1922_v48, %v1863_v23  ;;  %vm2063_vm12 = vmand %vm2036_vm10, %vm2059_vm11  ;;  %v2236_v23 = vrot.slane %v4448_v26, %v3828_v11 }
 0x1ad   :  { %v2067_v40 = vsel %vm2063_vm12, -0.0098, %v3639_v10  ;;  %p3623_p4 = pnand %p3622_p3, %p3616_p0 }
 0x1ae   :  { %1784 = vxpose.xlu1.b32.cont [12/16] (narrow) %v1672_v62, 16  ;;  %v1992_v24 = vadd.f32 %v1984_v55, %v1936_v56 }
 0x1b2   :  { %1785 = vxpose.xlu1.b32.cont [13/16] (narrow) %v1673_v63, 16  ;;  %v2472_v63 = vrot.slane %v2257_v31, %v3883_v51 }
 0x1b3   :  { %v3607_v52 = vpop.eup %3606 }
 0x1b4   :  { %v2012_v62 = vsel %vm1996_vm7, %v3607_v52, 0.0  ;;  %v2480_v30 = vcombine.high %v2472_v63, %v2472_v63  ;;  %v2488_v0 = vrot.slane %v2472_v63, %v3883_v51  ;;  %v4511_v63 = vmul.f32 %v2236_v23, %v4217_v4 }
 0x1b5   :  { %v2019_v5 = vrot.slane %v2012_v62, %v4421_v13 }
 0x1b6   :  { %1786 = vxpose.xlu1.b32.cont [14/16] (narrow) %v1674_v7, 16  ;;  %v4464_v7 = vmul.f32 0.125, %v4453_v17  ;;  %v2502_v29 = vrot.slane %v2480_v30, %v3883_v51  ;;  %v2510_v41 = vcombine.high %v2488_v0, %v2488_v0 }
 0x1b8   :  { %v1822_v32 = vrot.slane %v4464_v7, %v3828_v11  ;;  %v1878_v42 = vrot.slane %v4464_v7, %v3838_v14  ;;  %v1951_v22 = vrot.slane %v4464_v7, %v3841_v15  ;;  %v2796_v55 = vrot.slane %v2502_v29, %v3828_v11 }
 0x1b9   :  { %v2800_v12 = vrot.slane %v2510_v41, %v3828_v11 }
 0x1ba   :  { %1787 = vxpose.xlu1.b32.cont [15/16] (narrow) %v1675_v8, 16  ;;  %v2465_v8 = vcombine.high %v2257_v31, %v2257_v31  ;;  %v4484_v46 = vrot.slane %v1822_v32, %v3828_v11  ;;  %v2792_v31 = vrot.slane %v2488_v0, %v3828_v11  ;;  %v4500_v26 = vrot.slane %v1878_v42, %v3838_v14 }
 0x1bc   :  { %v4515_v18 = vmul.f32 %v2792_v31, %v4252_v1 }
 0x1be   :  { %1788 = vxpose.xlu1.b32.end [16/16] (narrow) %v1676_v33, 16 }
 0x1c2   :  { %v1725_v43 = vpop.trf.xlu1 }
 0x1c3   :  { %v1848_v28 = vmul.f32 %v1838_v38, %v1725_v43  ;;  %v1904_v47 = vmul.f32 %v1894_v39, %v1725_v43  ;;  %v2032_v38 = vmul.f32 %v2019_v5, %v1992_v24 }
 0x1c5   :  { %v1856_v57 = vrot.slane %v1848_v28, 3  ;;  %v1923_v59 = vrot.slane %v1904_v47, 6  ;;  %v2512_v28 = vcombine.high %v2502_v29, %v2502_v29  ;;  %v2071_v48 = vadd.f32 %v2067_v40, %v2032_v38 }
 0x1c6   :  { %v1726_v34 = vpop.trf.xlu1 }
 0x1c7   :  { %v1908_v58 = vmul.f32 %v1894_v39, %v1726_v34  ;;  %vm1997_vm9 = vcmp.gt.f32.partialorder %v1726_v34, 0.0  ;;  %v1864_v20 = vadd.f32 %v1856_v57, %v1725_v43  ;;  %v1977_v21 = vmul.f32 %v1967_v54, %v1726_v34 }
 0x1c8   :  { %v2001_v61 = vsel %vm1997_vm9, %v1726_v34, 1.0  ;;  %v2040_v6 = vsel %vm1997_vm9, 1, %v3641_v60  ;;  %v2479_v39 = vrot.slane %v2465_v8, %v3883_v51  ;;  %v2579_v43 = vcombine.high %v2577_v35, %v2577_v35 }
 0x1c9   :  { %v1924_v3 = vrot.slane %v1908_v58, 6  ;;  %3608 = vrcp.f32 %v2001_v61  ;;  %v2050_v2 = vrot.slane %v2040_v6, %v4421_v13  ;;  %v1985_v37 = vrot.slane %v1977_v21, 1 }
 0x1ca   :  { %v2481_v52 = vcombine.high %v2479_v39, %v2479_v39  ;;  %v2593_v57 = vrot.slane %v2577_v35, %v3883_v51  ;;  %v2607_v56 = vrot.slane %v2579_v43, %v3883_v51  ;;  %v2804_v61 = vrot.slane %v2512_v28, %v3828_v11 }
 0x1cb   :  { %v1925_v27 = vsel %vm1919_vm8, %v1923_v59, %v1924_v3  ;;  %vm2060_vm13 = vcmp.eq.s32.totalorder %v2050_v2, 1  ;;  %v4504_v59 = vmul.f32 %v2244_v44, %v4217_v4  ;;  %v2495_v62 = vrot.slane %v2479_v39, %v3883_v51 }
 0x1cc   :  { %v1937_v33 = vadd.f32 %v1925_v27, %v1864_v20  ;;  %vm2064_vm14 = vmand %vm2036_vm10, %vm2060_vm13  ;;  %vm2077_vm1 = vcmp.lt.f32.partialorder %v2071_v48, 0.0  ;;  %vm2093_vm2 = vcmp.gt.f32.partialorder %v2071_v48, 0.0  ;;  %v2509_v6 = vrot.slane %v2481_v52, %v3883_v51 }
 0x1cd   :  { %v2068_v34 = vsel %vm2064_vm14, -0.0098, %v3639_v10  ;;  %v4518_v8 = vmul.f32 %v2796_v55, %v4252_v1  ;;  %v4521_v20 = vmul.f32 %v2800_v12, %v4252_v1  ;;  %v2872_v21 = vrot.slane %v2593_v57, %v3828_v11 }
 0x1ce   :  { %v1993_v47 = vadd.f32 %v1985_v37, %v1937_v33  ;;  %v2876_v4 = vrot.slane %v2607_v56, %v3828_v11  ;;  %v2609_v5 = vcombine.high %v2593_v57, %v2593_v57  ;;  %v2611_v27 = vcombine.high %v2607_v56, %v2607_v56 }
 0x1cf   :  { %v2081_v2 = vsel %vm2077_vm1, 1, %v3641_v60  ;;  %v2097_v30 = vsel %vm2093_vm2, 1, %v3641_v60  ;;  %v2808_v35 = vrot.slane %v2495_v62, %v3828_v11  ;;  %v2619_v25 = vrot.slane %v4504_v59, %v3883_v51 }
 0x1d0   :  { %v4531_v32 = vmul.f32 %v2804_v61, %v4252_v1  ;;  %v2812_v0 = vrot.slane %v2509_v6, %v3828_v11  ;;  %v2511_v38 = vcombine.high %v2495_v62, %v2495_v62  ;;  %v2521_v39 = vrot.slane %v4511_v63, %v3883_v51 }
 0x1d1   :  { %v2880_v41 = vrot.slane %v2609_v5, %v3828_v11  ;;  %v2884_v42 = vrot.slane %v2611_v27, %v3828_v11  ;;  %v4541_v43 = vmul.f32 %v2872_v21, %v4252_v1  ;;  %v4544_v44 = vmul.f32 %v2876_v4, %v4252_v1 }
 0x1d2   :  { %v4547_v28 = vmul.f32 %v2808_v35, %v4252_v1  ;;  %v2627_v23 = vcombine.high %v2619_v25, %v2619_v25  ;;  %v1971_v52 = vrot.slane %v1951_v22, %v3841_v15  ;;  %v2513_v55 = vcombine.high %v2509_v6, %v2509_v6 }
 0x1d3   :  { %v3609_v45 = vpop.eup %3608  ;;  %v2529_v12 = vcombine.high %v2521_v39, %v2521_v39  ;;  %v4568_v57 = vmul.f32 %v2880_v41, %v4252_v1  ;;  %v2816_v56 = vrot.slane %v2511_v38, %v3828_v11  ;;  %v2612_v22 = vcombine.high %v4504_v59, %v4504_v59 }
 0x1d4   :  { %v2013_v54 = vsel %vm1997_vm9, %v3609_v45, 0.0  ;;  %v3562_v61 = vpack.c.bf16 %v4544_v44, %v4541_v43  ;;  %v2635_v62 = vrot.slane %v2619_v25, %v3883_v51  ;;  %v2514_v4 = vcombine.high %v4511_v63, %v4511_v63 }
 0x1d5   :  { %v2023_v58 = vrot.slane %v2013_v54, %v4421_v13  ;;  %v3556_v54 = vpack.c.bf16 %v4518_v8, %v4515_v18  ;;  %v2537_v8 = vrot.slane %v2521_v39, %v3883_v51  ;;  %v2820_v27 = vrot.slane %v2513_v55, %v3828_v11 }
 0x1d6   :  { %v2888_v35 = vrot.slane %v2635_v62, %v3828_v11 }
 0x1d7   :  { %v2033_v3 = vmul.f32 %v2023_v58, %v1993_v47  ;;  %v4550_v47 = vmul.f32 %v2812_v0, %v4252_v1  ;;  %v4571_v58 = vmul.f32 %v2884_v42, %v4252_v1  ;;  %v3020_v31 = vmul.f32 %v2820_v27, %v4252_v1 }
 0x1d8   :  { %v3037_v49 = vmul.f32 %v2888_v35, %v4252_v1 }
 0x1d9   :  { %v2072_v24 = vadd.f32 %v2068_v34, %v2033_v3  ;;  %v3560_v34 = vpack.c.bf16 %v4531_v32, %v4521_v20  ;;  %v2649_v3 = vrot.slane %v2627_v23, %v3883_v51  ;;  %v3564_v59 = vpack.c.bf16 %v4550_v47, %v4547_v28 }
 0x1da   :  { %v2551_v20 = vrot.slane %v2529_v12, %v3883_v51  ;;  %v3566_v5 = vpack.c.bf16 %v4571_v58, %v4568_v57  ;;  %v2657_v32 = vcombine.high %v2635_v62, %v2635_v62  ;;  %v2559_v28 = vcombine.high %v2537_v8, %v2537_v8 }
 0x1db   :  { %vm2078_vm3 = vcmp.lt.f32.partialorder %v2072_v24, 0.0  ;;  %vm2094_vm4 = vcmp.gt.f32.partialorder %v2072_v24, 0.0  ;;  %v2113_v45 = vcombine.low %v2071_v48, %v2072_v24  ;;  %v2892_v25 = vrot.slane %v2649_v3, %v3828_v11 }
 0x1dc   :  { %v2082_v33 = vsel %vm2078_vm3, 1, %v3641_v60  ;;  %v2098_v37 = vsel %vm2094_vm4, 1, %v3641_v60  ;;  %v2659_v0 = vcombine.high %v2649_v3, %v2649_v3  ;;  %v2896_v43 = vrot.slane %v2657_v32, %v3828_v11 }
 0x1dd   :  { %v2085_v40 = vcombine.low %v2081_v2, %v2082_v33  ;;  %v2101_v29 = vcombine.low %v2097_v30, %v2098_v37  ;;  %v2626_v2 = vrot.slane %v2612_v22, %v3883_v51  ;;  %v2824_v37 = vrot.slane %v2537_v8, %v3828_v11 }
 0x1de   :  { %v2900_v44 = vrot.slane %v2659_v0, %v3828_v11  ;;  %v2561_v23 = vcombine.high %v2551_v20, %v2551_v20  ;;  %v3039_v58 = vmul.f32 %v2896_v43, %v4252_v1  ;;  %v2832_v22 = vrot.slane %v2559_v28, %v3828_v11 }
 0x1df   :  { %vm2087_vm5 = vcmp.ne.s32.totalorder %v2085_v40, 0  ;;  %vm2103_vm6 = vcmp.ne.s32.totalorder %v2101_v29, 0  ;;  %v2828_v40 = vrot.slane %v2551_v20, %v3828_v11  ;;  %v2528_v29 = vrot.slane %v2514_v4, %v3883_v51 }
 0x1e0   :  { %vm4554_vm7 = vmand %vm2075_vm15, %vm2087_vm5  ;;  %v2628_v42 = vcombine.high %v2626_v2, %v2626_v2  ;;  %v3021_v48 = vmul.f32 %v2824_v37, %v4252_v1 }
 0x1e1   :  { %vm4563_vm9 = vmand %vm2091_vm0, %vm2103_vm6  ;;  %v2530_v53 = vcombine.high %v2528_v29, %v2528_v29  ;;  %v3022_v57 = vmul.f32 %v2828_v40, %v4252_v1  ;;  %v2544_v3 = vrot.slane %v2528_v29, %v3883_v51  ;;  %vm2076_vm6 = vcmp.lt.f32.partialorder %v4453_v17, 2.0 }
 0x1e2   :  { %vm2107_vm11 = vmor %vm4554_vm7, %vm4563_vm9  ;;  %v1757_v19 = vpop.trf.xlu0 }
 0x1e3   :  { %v2117_v6 = vsel %vm2107_vm11, 0.0, %v2113_v45  ;;  %v1849_v18 = vmul.f32 %v4484_v46, %v1757_v19  ;;  %vm3208_vm12 = vmneg %vm2107_vm11  ;;  %v1905_v24 = vmul.f32 %v4500_v26, %v1757_v19  ;;  %v4598_v46 = vmul.f32 %v2816_v56, %v4252_v1 }
 0x1e4   :  { %v3047_v21 = vcombine.high %v2117_v6, %v2117_v6  ;;  %v3040_v56 = vmul.f32 %v2900_v44, %v4252_v1  ;;  %v3572_v4 = vpack.c.bf16 %v3022_v57, %v3021_v48  ;;  %v2560_v0 = vcombine.high %v2544_v3, %v2544_v3 }
 0x1e5   :  { %v1857_v63 = vrot.slane %v1849_v18, 3  ;;  %v1926_v38 = vrot.slane %v1905_v24, 6  ;;  %v3568_v6 = vpack.c.bf16 %v3020_v31, %v4598_v46  ;;  %v2558_v18 = vrot.slane %v2530_v53, %v3883_v51 }
 0x1e6   :  { %3115 = vmatprep.mubr.f32.mxu1 %v3047_v21  ;;  %v4601_v30 = vpop.trf.xlu0  ;;  %v3574_v27 = vpack.c.bf16 %v3040_v56, %v3039_v58 }
 0x1e7   :  { %3209 = vmatmul.mubr.msk.f32.vlgmr.msra.gmra.mrb[22].mxu1 %vm3208_vm12, %v2113_v45  ;;  %v1909_v33 = vmul.f32 %v4500_v26, %v4601_v30  ;;  %vm1998_vm13 = vcmp.gt.f32.partialorder %v4601_v30, 0.0  ;;  %v1865_v45 = vadd.f32 %v1857_v63, %v1757_v19  ;;  %v1978_v47 = vmul.f32 %v1971_v52, %v4601_v30 }
 0x1e8   :  { %v2002_v39 = vsel %vm1998_vm13, %v4601_v30, 1.0  ;;  %3557 = vmatpush3.bf16.msra.mxu1 %v3556_v54  ;;  %v2041_v26 = vsel %vm1998_vm13, 1, %v3641_v60  ;;  %v2642_v54 = vrot.slane %v2626_v2, %v3883_v51  ;;  %v2656_v52 = vrot.slane %v2628_v42, %v3883_v51 }
 0x1e9   :  { %v1927_v41 = vrot.slane %v1909_v33, 6  ;;  %3610 = vrcp.f32 %v2002_v39  ;;  %3559 = vmatprep.subr.bf16.mxu1 %v3558_v50  ;;  %v2054_v12 = vrot.slane %v2041_v26, %v4421_v13  ;;  %v3038_v50 = vmul.f32 %v2892_v25, %v4252_v1 }
 0x1ea   :  { %v2836_v19 = vrot.slane %v2561_v23, %v3828_v11  ;;  %v1986_v62 = vrot.slane %v1978_v47, 1  ;;  %v2908_v21 = vrot.slane %v2656_v52, %v3828_v11  ;;  %v2658_v24 = vcombine.high %v2642_v54, %v2642_v54 }
 0x1eb   :  { %v1928_v55 = vsel %vm1919_vm8, %v1926_v38, %v1927_v41  ;;  %vm2061_vm14 = vcmp.eq.s32.totalorder %v2054_v12, 1  ;;  %v3570_v8 = vpack.c.bf16 %v3038_v50, %v3037_v49  ;;  %v2660_v20 = vcombine.high %v2656_v52, %v2656_v52 }
 0x1ec   :  { %3561 = vmatpush3.bf16.msra.mxu1 %v3560_v34  ;;  %v1938_v34 = vadd.f32 %v1928_v55, %v1865_v45  ;;  %v3023_v2 = vmul.f32 %v2832_v22, %v4252_v1  ;;  %vm2065_vm15 = vmand %vm2036_vm10, %vm2061_vm14  ;;  %v2840_v51 = vrot.slane %v2544_v3, %v3828_v11  ;;  %v2844_v32 = vrot.slane %v2558_v18, %v3828_v11 }
 0x1ed   :  { %3563 = vmatprep.subr.bf16.mxu1 %v3562_v61  ;;  %v2904_v61 = vrot.slane %v2642_v54, %v3828_v11  ;;  %v2562_v63 = vcombine.high %v2558_v18, %v2558_v18  ;;  %v3042_v37 = vmul.f32 %v2908_v21, %v4252_v1  ;;  %v2912_v38 = vrot.slane %v2658_v24, %v3828_v11 }
 0x1ee   :  { %v1994_v25 = vadd.f32 %v1986_v62, %v1938_v34  ;;  %v2916_v39 = vrot.slane %v2660_v20, %v3828_v11  ;;  %v2069_v40 = vsel %vm2065_vm15, -0.0098, %v3639_v10  ;;  %v3025_v30 = vmul.f32 %v2840_v51, %v4252_v1 }
 0x1ef   :  { %v3041_v46 = vmul.f32 %v2904_v61, %v4252_v1  ;;  %v3026_v26 = vmul.f32 %v2844_v32, %v4252_v1  ;;  %v2848_v42 = vrot.slane %v2560_v0, %v3828_v11  ;;  %v2852_v43 = vrot.slane %v2562_v63, %v3828_v11 }
 0x1f0   :  { %3565 = vmatpush3.bf16.msra.mxu1 %v3564_v59  ;;  %v3024_v59 = vmul.f32 %v2836_v19, %v4252_v1  ;;  %v3043_v23 = vmul.f32 %v2912_v38, %v4252_v1  ;;  %v3044_v45 = vmul.f32 %v2916_v39, %v4252_v1  ;;  %v1826_v47 = vrot.slane %v4464_v7, %v4421_v13  ;;  %v3614_v38 = vld [vmem:[%s4704_s2] sm:$0x7] }
 0x1f1   :  { %3567 = vmatprep.subr.bf16.mxu1 %v3566_v5  ;;  %v3578_v28 = vpack.c.bf16 %v3042_v37, %v3041_v46  ;;  %v3580_v31 = vpack.c.bf16 %v3026_v26, %v3025_v30  ;;  %v3027_v54 = vmul.f32 %v2848_v42, %v4252_v1  ;;  %v3028_v55 = vmul.f32 %v2852_v43, %v4252_v1 }
 0x1f2   :  { %v3576_v41 = vpack.c.bf16 %v3024_v59, %v3023_v2  ;;  %v1882_v12 = vrot.slane %v4464_v7, %v1873_v16  ;;  %v3582_v49 = vpack.c.bf16 %v3044_v45, %v3043_v23  ;;  %v1846_v53 = vrot.slane %v1826_v47, %v3828_v11 }
 0x1f3   :  { %v3611_v35 = vpop.eup %3610  ;;  %v1955_v50 = vrot.slane %v4464_v7, %v1946_v36  ;;  %v3584_v48 = vpack.c.bf16 %v3028_v55, %v3027_v54 }
 0x1f4   :  { %v2014_v5 = vsel %vm1998_vm13, %v3611_v35, 0.0  ;;  %3569 = vmatpush3.bf16.msra.mxu1 %v3568_v6  ;;  %v1902_v57 = vrot.slane %v1882_v12, %v3838_v14 }
 0x1f5   :  { %v2027_v33 = vrot.slane %v2014_v5, %v4421_v13  ;;  %3571 = vmatprep.subr.bf16.mxu1 %v3570_v8  ;;  %v1975_v1 = vrot.slane %v1955_v50, %v3841_v15 }
 0x1f7   :  { %v2034_v29 = vmul.f32 %v2027_v33, %v1994_v25 }
 0x1f8   :  { %3573 = vmatpush3.bf16.msra.mxu1 %v3572_v4 }
 0x1f9   :  { %v2073_v44 = vadd.f32 %v2069_v40, %v2034_v29  ;;  %3575 = vmatprep.subr.bf16.mxu1 %v3574_v27 }
 0x1fb   :  { %vm2095_vm3 = vcmp.gt.f32.partialorder %v2073_v44, 0.0 }
 0x1fc   :  { %3577 = vmatpush3.bf16.msra.mxu1 %v3576_v41  ;;  %v2099_v59 = vsel %vm2095_vm3, 1, %v3641_v60 }
 0x1fd   :  { %3579 = vmatprep.subr.bf16.mxu1 %v3578_v28 }
 0x200   :  { %3581 = vmatpush3.bf16.msra.mxu1 %v3580_v31 }
 0x201   :  { %3583 = vmatprep.subr.bf16.mxu1 %v3582_v49 }
 0x202   :  { %v1789_v52 = vpop.trf.xlu1 }
 0x203   :  { %v1850_v58 = vmul.f32 %v1846_v53, %v1789_v52  ;;  %v1906_v56 = vmul.f32 %v1902_v57, %v1789_v52 }
 0x204   :  { %3585 = vmatpush3.bf16.msra.mxu1 %v3584_v48 }
 0x205   :  { %v1858_v16 = vrot.slane %v1850_v58, 3  ;;  %v1929_v62 = vrot.slane %v1906_v56, 6 }
 0x206   :  { %v1790_v22 = vpop.trf.xlu1 }
 0x207   :  { %v1910_v19 = vmul.f32 %v1902_v57, %v1790_v22  ;;  %vm1999_vm0 = vcmp.gt.f32.partialorder %v1790_v22, 0.0  ;;  %v1979_v11 = vmul.f32 %v1975_v1, %v1790_v22  ;;  %v1866_v36 = vadd.f32 %v1858_v16, %v1789_v52 }
 0x208   :  { %v2003_v34 = vsel %vm1999_vm0, %v1790_v22, 1.0  ;;  %v2042_v14 = vsel %vm1999_vm0, 1, %v3641_v60 }
 0x209   :  { %v1930_v61 = vrot.slane %v1910_v19, 6  ;;  %3612 = vrcp.f32 %v2003_v34  ;;  %v1987_v6 = vrot.slane %v1979_v11, 1  ;;  %v2058_v15 = vrot.slane %v2042_v14, %v4421_v13 }
 0x20b   :  { %v1931_v7 = vsel %vm1919_vm8, %v1929_v62, %v1930_v61  ;;  %vm2062_vm1 = vcmp.eq.s32.totalorder %v2058_v15, 1  ;;  %vm2079_vm8 = vcmp.lt.f32.partialorder %v2073_v44, 0.0 }
 0x20c   :  { %v1939_v3 = vadd.f32 %v1931_v7, %v1866_v36  ;;  %vm2066_vm2 = vmand %vm2036_vm10, %vm2062_vm1  ;;  %v2083_v35 = vsel %vm2079_vm8, 1, %v3641_v60  ;;  %vm2092_vm10 = vcmp.gt.f32.partialorder %v4453_v17, 5.0 }
 0x20d   :  { %v2070_v4 = vsel %vm2066_vm2, -0.0098, %v3639_v10 }
 0x20e   :  { %v1995_v18 = vadd.f32 %v1987_v6, %v1939_v3 }
 0x213   :  { %v3613_v8 = vpop.eup %3612 }
 0x214   :  { %v2015_v21 = vsel %vm1999_vm0, %v3613_v8, 0.0 }
 0x215   :  { %v2031_v24 = vrot.slane %v2015_v21, %v4421_v13 }
 0x217   :  { %v2035_v20 = vmul.f32 %v2031_v24, %v1995_v18 }
 0x219   :  { %v2074_v27 = vadd.f32 %v2070_v4, %v2035_v20 }
 0x21b   :  { %vm2080_vm4 = vcmp.lt.f32.partialorder %v2074_v27, 0.0  ;;  %vm2096_vm5 = vcmp.gt.f32.partialorder %v2074_v27, 0.0  ;;  %v2114_v2 = vcombine.low %v2073_v44, %v2074_v27 }
 0x21c   :  { %v2084_v25 = vsel %vm2080_vm4, 1, %v3641_v60  ;;  %v2100_v13 = vsel %vm2096_vm5, 1, %v3641_v60 }
 0x21d   :  { %v2086_v9 = vcombine.low %v2083_v35, %v2084_v25  ;;  %v2102_v46 = vcombine.low %v2099_v59, %v2100_v13 }
 0x21f   :  { %vm2088_vm7 = vcmp.ne.s32.totalorder %v2086_v9, 0  ;;  %vm2104_vm9 = vcmp.ne.s32.totalorder %v2102_v46, 0 }
 0x220   :  { %vm2090_vm11 = vmand %vm2076_vm6, %vm2088_vm7 }
 0x221   :  { %vm2106_vm12 = vmand %vm2092_vm10, %vm2104_vm9 }
 0x222   :  { %vm2108_vm13 = vmor %vm2090_vm11, %vm2106_vm12 }
 0x223   :  { %v2118_v10 = vsel %vm2108_vm13, 0.0, %v2114_v2  ;;  %vm3210_vm14 = vmneg %vm2108_vm13 }
 0x224   :  { %v3048_v51 = vcombine.high %v2118_v10, %v2118_v10 }
 0x226   :  { %3185 = vmatprep.mubr.f32.mxu1 %v3048_v51 }
 0x227   :  { %3211 = vmatmul.mubr.msk.f32.vlgmr.msra.gmra.mrb[24].mxu1 %vm3210_vm14, %v2114_v2 }
 0x2ba   :  { %v3324_v5 = vpop.f32.mrb[22].mxu1 }
 0x2bb   :  { %v3325_v32 = vpop.f32.mrb[23].mxu1 }
 0x2bc   :  { %v3326_v0 = vadd.f32 %v3325_v32, %v3324_v5 }
 0x2fa   :  { %v3359_v60 = vpop.f32.mrb[24].mxu1 }
 0x2fb   :  { %v3360_v63 = vpop.f32.mrb[25].mxu1 }
 0x2fc   :  { %v3361_v33 = vadd.f32 %v3360_v63, %v3359_v60 }
 0x2fe   :  { %v3188_v37 = vadd.f32 %v3361_v33, %v3326_v0 }
 0x300   :  { %v3191_v17 = vmul.f32 0.001, %v3188_v37 }
 0x302   :  { %v3192_v39 = vadd.f32 %v3614_v38, %v3191_v17 }
 0x304   :  { %3193 = vst [vmem:[#allocation3] sm:$0x7] %v3192_v39 }
 0x305   :  { %3626 = shalt.err (!%p3623_p4)
}
 0x306   :  { %s3627_s0 = scalar_lea.hbm %s4706_s4, 64 }
 0x307   :  { %p3628_p5 = scmp.ne.s32.totalorder %s4706_s4, %s3627_s0  ;;  %p3631_p6 = scmp.lt.u32.totalorder %s3627_s0, %s4706_s4 }
 0x309   :  { %p3633_p7 = pnand %p3631_p6, %p3628_p5 }
 0x30b   :  { %3636 = shalt.err (!%p3633_p7)
}
 0x30c   :  { %3203 = dma.vmem_to_hbm [thread:$0]  %s3201_s27, 64, %s4706_s4, [#allocation4]  }
 0x30d   :  { %3637 = dma.done.wait [#allocation4], 64  }
 0x30e   :  { %3638 = vsyncadd [#allocation4], 4294967232 }
 0x30f   :  { %3207 = vsyncpa [#allocation4], 1 }

</bundles_post_ra>
